<compile_context>
chip_gen: v7x
topology: tpu7x:2x2x1
jax: 0.10.0
libtpu: 0.0.40
codegen_flags: <defaults>
</compile_context>

<pallas_src>
import functools

import numpy as np
import jax
import jax.numpy as jnp
from jax import lax
from jax.experimental import pallas as pl
from jax.experimental.pallas import tpu as pltpu


# ----------------------------------------------------------------------------
# Pallas kernel: per-edge scalar gather from a bit-packed adjacency mask.
# ----------------------------------------------------------------------------
def _edge_type_kernel(send_ref, rec_ref, adj_bits_ref, out_ref, *, num_nodes):
    """out[e] = bit (send[e] * N + rec[e]) of the bit-packed adjacency mask.

    send_ref, rec_ref : (E,)  int32 per-edge sender / receiver node indices (SMEM)
    adj_bits_ref      : (W,)  int32 bit-packed (adj != 0) mask, 32 entries/word (SMEM)
    out_ref           : (E,)  int32 edge types in {0, 1} (SMEM)
    """
    num_edges = out_ref.shape[0]

    def one_edge(e):
        idx = send_ref[e] * num_nodes + rec_ref[e]
        word = adj_bits_ref[idx >> 5]           # which 32-bit word
        out_ref[e] = (word >> (idx & 31)) & 1   # extract bit (arith shift + mask ok)

    if num_edges <= 1024:
        # E is static: full trace-time unroll — pure straight-line scalar code,
        # 2 scalar-ALU slots/cycle get packed by the LLO scheduler.
        for e in range(num_edges):
            one_edge(e)
    else:
        def body(e, carry):
            one_edge(e)
            return carry
        lax.fori_loop(0, num_edges, body, 0, unroll=8)


# ----------------------------------------------------------------------------
# One-time precompute (equivalent of torch's cached self.edge_types buffer).
# ----------------------------------------------------------------------------
def _pack_bits_int32(mask_flat_i32):
    """Pack a flat {0,1} int32 vector into int32 words, 32 entries per word."""
    n = mask_flat_i32.shape[0]
    n_pad = ((n + 31) // 32) * 32
    padded = jnp.zeros((n_pad,), jnp.int32).at[:n].set(mask_flat_i32)
    shifts = jnp.arange(32, dtype=jnp.int32)
    # Distinct powers of two -> wrapping int32 sum reproduces the exact bit pattern.
    return jnp.sum(padded.reshape(-1, 32) << shifts[None, :], axis=-1, dtype=jnp.int32)


def precompute_edge_log_onehot(rel_rec, rel_send, adj_matrix, num_classes=2):
    """Run the Pallas gather ONCE and return the cached (E, num_classes) f32 table
    log(one_hot(edge_type)) — 0.0 on the selected class, -inf elsewhere."""
    E, N = rel_rec.shape

    # Indices from one-hot rows via a single dot with iota (no per-step argmax).
    iota = jnp.arange(N, dtype=rel_send.dtype)
    send_idx = jnp.dot(rel_send, iota).astype(jnp.int32)   # (E,)
    rec_idx = jnp.dot(rel_rec, iota).astype(jnp.int32)     # (E,)

    # Nonzero test on the ORIGINAL dtype, then bit-pack for SMEM (32x smaller).
    adj_bits = _pack_bits_int32((adj_matrix != 0).astype(jnp.int32).reshape(-1))

    smem = pl.BlockSpec(memory_space=pltpu.MemorySpace.SMEM)
    edge_type = pl.pallas_call(
        functools.partial(_edge_type_kernel, num_nodes=N),
        out_shape=jax.ShapeDtypeStruct((E,), jnp.int32),
        in_specs=[smem, smem, smem],
        out_specs=smem,
    )(send_idx, rec_idx, adj_bits)                          # (E,) int32 in {0,1}

    # TODO(synk): torch's F.one_hot without num_classes infers max+1 classes, so if
    # adj.sum()!=0 but no edge hits a nonzero entry torch returns (B,E,1); we always
    # emit num_classes=2 (the intended / common case, and exact when adj.sum()==0).
    cls = jnp.arange(num_classes, dtype=jnp.int32)
    return jnp.where(edge_type[:, None] == cls[None, :],
                     jnp.float32(0.0), jnp.float32(-jnp.inf))   # (E, 2)


# ----------------------------------------------------------------------------
# Per-step forward: only a batch broadcast of the cached table.
# ----------------------------------------------------------------------------
def fixed_encoder_global_step(inputs, global_inputs, edge_log_onehot):
    """Steady-state forward given the cached (E, C) table. Returns (B, E, C) f32.

    NOTE: for large B, prefer consuming the (E, C) table directly at the
    consumer instead of materializing the batch repeat (lane-sparse last dim)."""
    del global_inputs
    B = inputs.shape[0]
    E, C = edge_log_onehot.shape
    return jnp.broadcast_to(edge_log_onehot[None, :, :], (B, E, C))


def fixed_encoder_global(inputs, global_inputs, rel_rec, rel_send, adj_matrix):
    """Signature-compatible one-shot wrapper (precompute + broadcast)."""
    edge_log = precompute_edge_log_onehot(rel_rec, rel_send, adj_matrix)
    return fixed_encoder_global_step(inputs, global_inputs, edge_log)


def _build_rel_matrices(num_atoms):
    """Standard NRI fully-connected (no self-loop) receiver/sender one-hots.
    Also returns the integer receiver/sender indices (avoid re-deriving them)."""
    off_diag = np.ones((num_atoms, num_atoms)) - np.eye(num_atoms)
    recv_idx, send_idx = np.where(off_diag)
    eye = np.eye(num_atoms, dtype=np.float32)
    rel_rec = eye[recv_idx]    # (E, N)
    rel_send = eye[send_idx]   # (E, N)
    return rel_rec, rel_send, recv_idx.astype(np.int32), send_idx.astype(np.int32)


if __name__ == "__main__":
    key = jax.random.PRNGKey(0)
    k_adj, k_in, k_glob = jax.random.split(key, 3)

    B, N, T, D = 2, 8, 12, 4
    E = N * (N - 1)  # 56 edges

    adj_matrix = jax.random.bernoulli(k_adj, 0.5, (N, N)).astype(jnp.float32)
    inputs = jax.random.normal(k_in, (B, N, T, D), dtype=jnp.float32)
    global_inputs = jax.random.normal(k_glob, (B, T, 2), dtype=jnp.float32)

    rel_rec_np, rel_send_np, recv_idx_np, send_idx_np = _build_rel_matrices(N)
    rel_rec = jnp.asarray(rel_rec_np)
    rel_send = jnp.asarray(rel_send_np)

    # One-time precompute (mirrors torch's cached self.edge_types), then the
    # cheap per-step forward.
    edge_log_onehot = jax.block_until_ready(
        precompute_edge_log_onehot(rel_rec, rel_send, adj_matrix))
    out = fixed_encoder_global_step(inputs, global_inputs, edge_log_onehot)
    out = jax.block_until_ready(out)

    # Reference (mirrors the PyTorch loop) for a correctness check.
    adj_np = np.asarray(adj_matrix)
    edge_types = np.zeros(E, dtype=np.int64)
    for e in range(E):
        r = int(recv_idx_np[e])
        s = int(send_idx_np[e])
        if adj_np[s, r]:
            edge_types[e] = 1
    one_hot = np.eye(2, dtype=np.float32)[edge_types]
    with np.errstate(divide="ignore"):
        ref = np.log(np.tile(one_hot[None], (B, 1, 1)))

    assert out.shape == (B, E, 2) and out.dtype == jnp.float32
    assert np.array_equal(np.asarray(out), ref)

    print("KERNEL_OK")
</pallas_src>

<mosaic_0001>
module attributes {stable_mosaic.version = 11 : i64} {
  func.func @_edge_type_kernel(%arg0: memref<56xi32, #tpu.memory_space<smem>>, %arg1: memref<56xi32, #tpu.memory_space<smem>>, %arg2: memref<2xi32, #tpu.memory_space<smem>>, %arg3: memref<56xi32, #tpu.memory_space<smem>>) attributes {dimension_semantics = [], scalar_prefetch = 0 : i64, scratch_operands = 0 : i64, tpu.core_type = #tpu.core_type<tc>} {
    %c0 = arith.constant 0 : index
    %0 = memref.load %arg0[%c0] : memref<56xi32, #tpu.memory_space<smem>>
    %c8_i32 = arith.constant 8 : i32
    %1 = arith.muli %0, %c8_i32 : i32
    %c0_0 = arith.constant 0 : index
    %2 = memref.load %arg1[%c0_0] : memref<56xi32, #tpu.memory_space<smem>>
    %3 = arith.addi %1, %2 : i32
    %c5_i32 = arith.constant 5 : i32
    %4 = arith.shrsi %3, %c5_i32 : i32
    %5 = arith.index_cast %4 : i32 to index
    %6 = memref.load %arg2[%5] : memref<2xi32, #tpu.memory_space<smem>>
    %c31_i32 = arith.constant 31 : i32
    %7 = arith.andi %3, %c31_i32 : i32
    %8 = arith.shrsi %6, %7 : i32
    %c1_i32 = arith.constant 1 : i32
    %9 = arith.andi %8, %c1_i32 : i32
    %c0_1 = arith.constant 0 : index
    %10 = memref.load %arg3[%c0_1] : memref<56xi32, #tpu.memory_space<smem>>
    memref.store %9, %arg3[%c0_1] : memref<56xi32, #tpu.memory_space<smem>>
    %c1 = arith.constant 1 : index
    %11 = memref.load %arg0[%c1] : memref<56xi32, #tpu.memory_space<smem>>
    %c8_i32_2 = arith.constant 8 : i32
    %12 = arith.muli %11, %c8_i32_2 : i32
    %c1_3 = arith.constant 1 : index
    %13 = memref.load %arg1[%c1_3] : memref<56xi32, #tpu.memory_space<smem>>
    %14 = arith.addi %12, %13 : i32
    %c5_i32_4 = arith.constant 5 : i32
    %15 = arith.shrsi %14, %c5_i32_4 : i32
    %16 = arith.index_cast %15 : i32 to index
    %17 = memref.load %arg2[%16] : memref<2xi32, #tpu.memory_space<smem>>
    %c31_i32_5 = arith.constant 31 : i32
    %18 = arith.andi %14, %c31_i32_5 : i32
    %19 = arith.shrsi %17, %18 : i32
    %c1_i32_6 = arith.constant 1 : i32
    %20 = arith.andi %19, %c1_i32_6 : i32
    %c1_7 = arith.constant 1 : index
    %21 = memref.load %arg3[%c1_7] : memref<56xi32, #tpu.memory_space<smem>>
    memref.store %20, %arg3[%c1_7] : memref<56xi32, #tpu.memory_space<smem>>
    %c2 = arith.constant 2 : index
    %22 = memref.load %arg0[%c2] : memref<56xi32, #tpu.memory_space<smem>>
    %c8_i32_8 = arith.constant 8 : i32
    %23 = arith.muli %22, %c8_i32_8 : i32
    %c2_9 = arith.constant 2 : index
    %24 = memref.load %arg1[%c2_9] : memref<56xi32, #tpu.memory_space<smem>>
    %25 = arith.addi %23, %24 : i32
    %c5_i32_10 = arith.constant 5 : i32
    %26 = arith.shrsi %25, %c5_i32_10 : i32
    %27 = arith.index_cast %26 : i32 to index
    %28 = memref.load %arg2[%27] : memref<2xi32, #tpu.memory_space<smem>>
    %c31_i32_11 = arith.constant 31 : i32
    %29 = arith.andi %25, %c31_i32_11 : i32
    %30 = arith.shrsi %28, %29 : i32
    %c1_i32_12 = arith.constant 1 : i32
    %31 = arith.andi %30, %c1_i32_12 : i32
    %c2_13 = arith.constant 2 : index
    %32 = memref.load %arg3[%c2_13] : memref<56xi32, #tpu.memory_space<smem>>
    memref.store %31, %arg3[%c2_13] : memref<56xi32, #tpu.memory_space<smem>>
    %c3 = arith.constant 3 : index
    %33 = memref.load %arg0[%c3] : memref<56xi32, #tpu.memory_space<smem>>
    %c8_i32_14 = arith.constant 8 : i32
    %34 = arith.muli %33, %c8_i32_14 : i32
    %c3_15 = arith.constant 3 : index
    %35 = memref.load %arg1[%c3_15] : memref<56xi32, #tpu.memory_space<smem>>
    %36 = arith.addi %34, %35 : i32
    %c5_i32_16 = arith.constant 5 : i32
    %37 = arith.shrsi %36, %c5_i32_16 : i32
    %38 = arith.index_cast %37 : i32 to index
    %39 = memref.load %arg2[%38] : memref<2xi32, #tpu.memory_space<smem>>
    %c31_i32_17 = arith.constant 31 : i32
    %40 = arith.andi %36, %c31_i32_17 : i32
    %41 = arith.shrsi %39, %40 : i32
    %c1_i32_18 = arith.constant 1 : i32
    %42 = arith.andi %41, %c1_i32_18 : i32
    %c3_19 = arith.constant 3 : index
    %43 = memref.load %arg3[%c3_19] : memref<56xi32, #tpu.memory_space<smem>>
    memref.store %42, %arg3[%c3_19] : memref<56xi32, #tpu.memory_space<smem>>
    %c4 = arith.constant 4 : index
    %44 = memref.load %arg0[%c4] : memref<56xi32, #tpu.memory_space<smem>>
    %c8_i32_20 = arith.constant 8 : i32
    %45 = arith.muli %44, %c8_i32_20 : i32
    %c4_21 = arith.constant 4 : index
    %46 = memref.load %arg1[%c4_21] : memref<56xi32, #tpu.memory_space<smem>>
    %47 = arith.addi %45, %46 : i32
    %c5_i32_22 = arith.constant 5 : i32
    %48 = arith.shrsi %47, %c5_i32_22 : i32
    %49 = arith.index_cast %48 : i32 to index
    %50 = memref.load %arg2[%49] : memref<2xi32, #tpu.memory_space<smem>>
    %c31_i32_23 = arith.constant 31 : i32
    %51 = arith.andi %47, %c31_i32_23 : i32
    %52 = arith.shrsi %50, %51 : i32
    %c1_i32_24 = arith.constant 1 : i32
    %53 = arith.andi %52, %c1_i32_24 : i32
    %c4_25 = arith.constant 4 : index
    %54 = memref.load %arg3[%c4_25] : memref<56xi32, #tpu.memory_space<smem>>
    memref.store %53, %arg3[%c4_25] : memref<56xi32, #tpu.memory_space<smem>>
    %c5 = arith.constant 5 : index
    %55 = memref.load %arg0[%c5] : memref<56xi32, #tpu.memory_space<smem>>
    %c8_i32_26 = arith.constant 8 : i32
    %56 = arith.muli %55, %c8_i32_26 : i32
    %c5_27 = arith.constant 5 : index
    %57 = memref.load %arg1[%c5_27] : memref<56xi32, #tpu.memory_space<smem>>
    %58 = arith.addi %56, %57 : i32
    %c5_i32_28 = arith.constant 5 : i32
    %59 = arith.shrsi %58, %c5_i32_28 : i32
    %60 = arith.index_cast %59 : i32 to index
    %61 = memref.load %arg2[%60] : memref<2xi32, #tpu.memory_space<smem>>
    %c31_i32_29 = arith.constant 31 : i32
    %62 = arith.andi %58, %c31_i32_29 : i32
    %63 = arith.shrsi %61, %62 : i32
    %c1_i32_30 = arith.constant 1 : i32
    %64 = arith.andi %63, %c1_i32_30 : i32
    %c5_31 = arith.constant 5 : index
    %65 = memref.load %arg3[%c5_31] : memref<56xi32, #tpu.memory_space<smem>>
    memref.store %64, %arg3[%c5_31] : memref<56xi32, #tpu.memory_space<smem>>
    %c6 = arith.constant 6 : index
    %66 = memref.load %arg0[%c6] : memref<56xi32, #tpu.memory_space<smem>>
    %c8_i32_32 = arith.constant 8 : i32
    %67 = arith.muli %66, %c8_i32_32 : i32
    %c6_33 = arith.constant 6 : index
    %68 = memref.load %arg1[%c6_33] : memref<56xi32, #tpu.memory_space<smem>>
    %69 = arith.addi %67, %68 : i32
    %c5_i32_34 = arith.constant 5 : i32
    %70 = arith.shrsi %69, %c5_i32_34 : i32
    %71 = arith.index_cast %70 : i32 to index
    %72 = memref.load %arg2[%71] : memref<2xi32, #tpu.memory_space<smem>>
    %c31_i32_35 = arith.constant 31 : i32
    %73 = arith.andi %69, %c31_i32_35 : i32
    %74 = arith.shrsi %72, %73 : i32
    %c1_i32_36 = arith.constant 1 : i32
    %75 = arith.andi %74, %c1_i32_36 : i32
    %c6_37 = arith.constant 6 : index
    %76 = memref.load %arg3[%c6_37] : memref<56xi32, #tpu.memory_space<smem>>
    memref.store %75, %arg3[%c6_37] : memref<56xi32, #tpu.memory_space<smem>>
    %c7 = arith.constant 7 : index
    %77 = memref.load %arg0[%c7] : memref<56xi32, #tpu.memory_space<smem>>
    %c8_i32_38 = arith.constant 8 : i32
    %78 = arith.muli %77, %c8_i32_38 : i32
    %c7_39 = arith.constant 7 : index
    %79 = memref.load %arg1[%c7_39] : memref<56xi32, #tpu.memory_space<smem>>
    %80 = arith.addi %78, %79 : i32
    %c5_i32_40 = arith.constant 5 : i32
    %81 = arith.shrsi %80, %c5_i32_40 : i32
    %82 = arith.index_cast %81 : i32 to index
    %83 = memref.load %arg2[%82] : memref<2xi32, #tpu.memory_space<smem>>
    %c31_i32_41 = arith.constant 31 : i32
    %84 = arith.andi %80, %c31_i32_41 : i32
    %85 = arith.shrsi %83, %84 : i32
    %c1_i32_42 = arith.constant 1 : i32
    %86 = arith.andi %85, %c1_i32_42 : i32
    %c7_43 = arith.constant 7 : index
    %87 = memref.load %arg3[%c7_43] : memref<56xi32, #tpu.memory_space<smem>>
    memref.store %86, %arg3[%c7_43] : memref<56xi32, #tpu.memory_space<smem>>
    %c8 = arith.constant 8 : index
    %88 = memref.load %arg0[%c8] : memref<56xi32, #tpu.memory_space<smem>>
    %c8_i32_44 = arith.constant 8 : i32
    %89 = arith.muli %88, %c8_i32_44 : i32
    %c8_45 = arith.constant 8 : index
    %90 = memref.load %arg1[%c8_45] : memref<56xi32, #tpu.memory_space<smem>>
    %91 = arith.addi %89, %90 : i32
    %c5_i32_46 = arith.constant 5 : i32
    %92 = arith.shrsi %91, %c5_i32_46 : i32
    %93 = arith.index_cast %92 : i32 to index
    %94 = memref.load %arg2[%93] : memref<2xi32, #tpu.memory_space<smem>>
    %c31_i32_47 = arith.constant 31 : i32
    %95 = arith.andi %91, %c31_i32_47 : i32
    %96 = arith.shrsi %94, %95 : i32
    %c1_i32_48 = arith.constant 1 : i32
    %97 = arith.andi %96, %c1_i32_48 : i32
    %c8_49 = arith.constant 8 : index
    %98 = memref.load %arg3[%c8_49] : memref<56xi32, #tpu.memory_space<smem>>
    memref.store %97, %arg3[%c8_49] : memref<56xi32, #tpu.memory_space<smem>>
    %c9 = arith.constant 9 : index
    %99 = memref.load %arg0[%c9] : memref<56xi32, #tpu.memory_space<smem>>
    %c8_i32_50 = arith.constant 8 : i32
    %100 = arith.muli %99, %c8_i32_50 : i32
    %c9_51 = arith.constant 9 : index
    %101 = memref.load %arg1[%c9_51] : memref<56xi32, #tpu.memory_space<smem>>
    %102 = arith.addi %100, %101 : i32
    %c5_i32_52 = arith.constant 5 : i32
    %103 = arith.shrsi %102, %c5_i32_52 : i32
    %104 = arith.index_cast %103 : i32 to index
    %105 = memref.load %arg2[%104] : memref<2xi32, #tpu.memory_space<smem>>
    %c31_i32_53 = arith.constant 31 : i32
    %106 = arith.andi %102, %c31_i32_53 : i32
    %107 = arith.shrsi %105, %106 : i32
    %c1_i32_54 = arith.constant 1 : i32
    %108 = arith.andi %107, %c1_i32_54 : i32
    %c9_55 = arith.constant 9 : index
    %109 = memref.load %arg3[%c9_55] : memref<56xi32, #tpu.memory_space<smem>>
    memref.store %108, %arg3[%c9_55] : memref<56xi32, #tpu.memory_space<smem>>
    %c10 = arith.constant 10 : index
    %110 = memref.load %arg0[%c10] : memref<56xi32, #tpu.memory_space<smem>>
    %c8_i32_56 = arith.constant 8 : i32
    %111 = arith.muli %110, %c8_i32_56 : i32
    %c10_57 = arith.constant 10 : index
    %112 = memref.load %arg1[%c10_57] : memref<56xi32, #tpu.memory_space<smem>>
    %113 = arith.addi %111, %112 : i32
    %c5_i32_58 = arith.constant 5 : i32
    %114 = arith.shrsi %113, %c5_i32_58 : i32
    %115 = arith.index_cast %114 : i32 to index
    %116 = memref.load %arg2[%115] : memref<2xi32, #tpu.memory_space<smem>>
    %c31_i32_59 = arith.constant 31 : i32
    %117 = arith.andi %113, %c31_i32_59 : i32
    %118 = arith.shrsi %116, %117 : i32
    %c1_i32_60 = arith.constant 1 : i32
    %119 = arith.andi %118, %c1_i32_60 : i32
    %c10_61 = arith.constant 10 : index
    %120 = memref.load %arg3[%c10_61] : memref<56xi32, #tpu.memory_space<smem>>
    memref.store %119, %arg3[%c10_61] : memref<56xi32, #tpu.memory_space<smem>>
    %c11 = arith.constant 11 : index
    %121 = memref.load %arg0[%c11] : memref<56xi32, #tpu.memory_space<smem>>
    %c8_i32_62 = arith.constant 8 : i32
    %122 = arith.muli %121, %c8_i32_62 : i32
    %c11_63 = arith.constant 11 : index
    %123 = memref.load %arg1[%c11_63] : memref<56xi32, #tpu.memory_space<smem>>
    %124 = arith.addi %122, %123 : i32
    %c5_i32_64 = arith.constant 5 : i32
    %125 = arith.shrsi %124, %c5_i32_64 : i32
    %126 = arith.index_cast %125 : i32 to index
    %127 = memref.load %arg2[%126] : memref<2xi32, #tpu.memory_space<smem>>
    %c31_i32_65 = arith.constant 31 : i32
    %128 = arith.andi %124, %c31_i32_65 : i32
    %129 = arith.shrsi %127, %128 : i32
    %c1_i32_66 = arith.constant 1 : i32
    %130 = arith.andi %129, %c1_i32_66 : i32
    %c11_67 = arith.constant 11 : index
    %131 = memref.load %arg3[%c11_67] : memref<56xi32, #tpu.memory_space<smem>>
    memref.store %130, %arg3[%c11_67] : memref<56xi32, #tpu.memory_space<smem>>
    %c12 = arith.constant 12 : index
    %132 = memref.load %arg0[%c12] : memref<56xi32, #tpu.memory_space<smem>>
    %c8_i32_68 = arith.constant 8 : i32
    %133 = arith.muli %132, %c8_i32_68 : i32
    %c12_69 = arith.constant 12 : index
    %134 = memref.load %arg1[%c12_69] : memref<56xi32, #tpu.memory_space<smem>>
    %135 = arith.addi %133, %134 : i32
    %c5_i32_70 = arith.constant 5 : i32
    %136 = arith.shrsi %135, %c5_i32_70 : i32
    %137 = arith.index_cast %136 : i32 to index
    %138 = memref.load %arg2[%137] : memref<2xi32, #tpu.memory_space<smem>>
    %c31_i32_71 = arith.constant 31 : i32
    %139 = arith.andi %135, %c31_i32_71 : i32
    %140 = arith.shrsi %138, %139 : i32
    %c1_i32_72 = arith.constant 1 : i32
    %141 = arith.andi %140, %c1_i32_72 : i32
    %c12_73 = arith.constant 12 : index
    %142 = memref.load %arg3[%c12_73] : memref<56xi32, #tpu.memory_space<smem>>
    memref.store %141, %arg3[%c12_73] : memref<56xi32, #tpu.memory_space<smem>>
    %c13 = arith.constant 13 : index
    %143 = memref.load %arg0[%c13] : memref<56xi32, #tpu.memory_space<smem>>
    %c8_i32_74 = arith.constant 8 : i32
    %144 = arith.muli %143, %c8_i32_74 : i32
    %c13_75 = arith.constant 13 : index
    %145 = memref.load %arg1[%c13_75] : memref<56xi32, #tpu.memory_space<smem>>
    %146 = arith.addi %144, %145 : i32
    %c5_i32_76 = arith.constant 5 : i32
    %147 = arith.shrsi %146, %c5_i32_76 : i32
    %148 = arith.index_cast %147 : i32 to index
    %149 = memref.load %arg2[%148] : memref<2xi32, #tpu.memory_space<smem>>
    %c31_i32_77 = arith.constant 31 : i32
    %150 = arith.andi %146, %c31_i32_77 : i32
    %151 = arith.shrsi %149, %150 : i32
    %c1_i32_78 = arith.constant 1 : i32
    %152 = arith.andi %151, %c1_i32_78 : i32
    %c13_79 = arith.constant 13 : index
    %153 = memref.load %arg3[%c13_79] : memref<56xi32, #tpu.memory_space<smem>>
    memref.store %152, %arg3[%c13_79] : memref<56xi32, #tpu.memory_space<smem>>
    %c14 = arith.constant 14 : index
    %154 = memref.load %arg0[%c14] : memref<56xi32, #tpu.memory_space<smem>>
    %c8_i32_80 = arith.constant 8 : i32
    %155 = arith.muli %154, %c8_i32_80 : i32
    %c14_81 = arith.constant 14 : index
    %156 = memref.load %arg1[%c14_81] : memref<56xi32, #tpu.memory_space<smem>>
    %157 = arith.addi %155, %156 : i32
    %c5_i32_82 = arith.constant 5 : i32
    %158 = arith.shrsi %157, %c5_i32_82 : i32
    %159 = arith.index_cast %158 : i32 to index
    %160 = memref.load %arg2[%159] : memref<2xi32, #tpu.memory_space<smem>>
    %c31_i32_83 = arith.constant 31 : i32
    %161 = arith.andi %157, %c31_i32_83 : i32
    %162 = arith.shrsi %160, %161 : i32
    %c1_i32_84 = arith.constant 1 : i32
    %163 = arith.andi %162, %c1_i32_84 : i32
    %c14_85 = arith.constant 14 : index
    %164 = memref.load %arg3[%c14_85] : memref<56xi32, #tpu.memory_space<smem>>
    memref.store %163, %arg3[%c14_85] : memref<56xi32, #tpu.memory_space<smem>>
    %c15 = arith.constant 15 : index
    %165 = memref.load %arg0[%c15] : memref<56xi32, #tpu.memory_space<smem>>
    %c8_i32_86 = arith.constant 8 : i32
    %166 = arith.muli %165, %c8_i32_86 : i32
    %c15_87 = arith.constant 15 : index
    %167 = memref.load %arg1[%c15_87] : memref<56xi32, #tpu.memory_space<smem>>
    %168 = arith.addi %166, %167 : i32
    %c5_i32_88 = arith.constant 5 : i32
    %169 = arith.shrsi %168, %c5_i32_88 : i32
    %170 = arith.index_cast %169 : i32 to index
    %171 = memref.load %arg2[%170] : memref<2xi32, #tpu.memory_space<smem>>
    %c31_i32_89 = arith.constant 31 : i32
    %172 = arith.andi %168, %c31_i32_89 : i32
    %173 = arith.shrsi %171, %172 : i32
    %c1_i32_90 = arith.constant 1 : i32
    %174 = arith.andi %173, %c1_i32_90 : i32
    %c15_91 = arith.constant 15 : index
    %175 = memref.load %arg3[%c15_91] : memref<56xi32, #tpu.memory_space<smem>>
    memref.store %174, %arg3[%c15_91] : memref<56xi32, #tpu.memory_space<smem>>
    %c16 = arith.constant 16 : index
    %176 = memref.load %arg0[%c16] : memref<56xi32, #tpu.memory_space<smem>>
    %c8_i32_92 = arith.constant 8 : i32
    %177 = arith.muli %176, %c8_i32_92 : i32
    %c16_93 = arith.constant 16 : index
    %178 = memref.load %arg1[%c16_93] : memref<56xi32, #tpu.memory_space<smem>>
    %179 = arith.addi %177, %178 : i32
    %c5_i32_94 = arith.constant 5 : i32
    %180 = arith.shrsi %179, %c5_i32_94 : i32
    %181 = arith.index_cast %180 : i32 to index
    %182 = memref.load %arg2[%181] : memref<2xi32, #tpu.memory_space<smem>>
    %c31_i32_95 = arith.constant 31 : i32
    %183 = arith.andi %179, %c31_i32_95 : i32
    %184 = arith.shrsi %182, %183 : i32
    %c1_i32_96 = arith.constant 1 : i32
    %185 = arith.andi %184, %c1_i32_96 : i32
    %c16_97 = arith.constant 16 : index
    %186 = memref.load %arg3[%c16_97] : memref<56xi32, #tpu.memory_space<smem>>
    memref.store %185, %arg3[%c16_97] : memref<56xi32, #tpu.memory_space<smem>>
    %c17 = arith.constant 17 : index
    %187 = memref.load %arg0[%c17] : memref<56xi32, #tpu.memory_space<smem>>
    %c8_i32_98 = arith.constant 8 : i32
    %188 = arith.muli %187, %c8_i32_98 : i32
    %c17_99 = arith.constant 17 : index
    %189 = memref.load %arg1[%c17_99] : memref<56xi32, #tpu.memory_space<smem>>
    %190 = arith.addi %188, %189 : i32
    %c5_i32_100 = arith.constant 5 : i32
    %191 = arith.shrsi %190, %c5_i32_100 : i32
    %192 = arith.index_cast %191 : i32 to index
    %193 = memref.load %arg2[%192] : memref<2xi32, #tpu.memory_space<smem>>
    %c31_i32_101 = arith.constant 31 : i32
    %194 = arith.andi %190, %c31_i32_101 : i32
    %195 = arith.shrsi %193, %194 : i32
    %c1_i32_102 = arith.constant 1 : i32
    %196 = arith.andi %195, %c1_i32_102 : i32
    %c17_103 = arith.constant 17 : index
    %197 = memref.load %arg3[%c17_103] : memref<56xi32, #tpu.memory_space<smem>>
    memref.store %196, %arg3[%c17_103] : memref<56xi32, #tpu.memory_space<smem>>
    %c18 = arith.constant 18 : index
    %198 = memref.load %arg0[%c18] : memref<56xi32, #tpu.memory_space<smem>>
    %c8_i32_104 = arith.constant 8 : i32
    %199 = arith.muli %198, %c8_i32_104 : i32
    %c18_105 = arith.constant 18 : index
    %200 = memref.load %arg1[%c18_105] : memref<56xi32, #tpu.memory_space<smem>>
    %201 = arith.addi %199, %200 : i32
    %c5_i32_106 = arith.constant 5 : i32
    %202 = arith.shrsi %201, %c5_i32_106 : i32
    %203 = arith.index_cast %202 : i32 to index
    %204 = memref.load %arg2[%203] : memref<2xi32, #tpu.memory_space<smem>>
    %c31_i32_107 = arith.constant 31 : i32
    %205 = arith.andi %201, %c31_i32_107 : i32
    %206 = arith.shrsi %204, %205 : i32
    %c1_i32_108 = arith.constant 1 : i32
    %207 = arith.andi %206, %c1_i32_108 : i32
    %c18_109 = arith.constant 18 : index
    %208 = memref.load %arg3[%c18_109] : memref<56xi32, #tpu.memory_space<smem>>
    memref.store %207, %arg3[%c18_109] : memref<56xi32, #tpu.memory_space<smem>>
    %c19 = arith.constant 19 : index
    %209 = memref.load %arg0[%c19] : memref<56xi32, #tpu.memory_space<smem>>
    %c8_i32_110 = arith.constant 8 : i32
    %210 = arith.muli %209, %c8_i32_110 : i32
    %c19_111 = arith.constant 19 : index
    %211 = memref.load %arg1[%c19_111] : memref<56xi32, #tpu.memory_space<smem>>
    %212 = arith.addi %210, %211 : i32
    %c5_i32_112 = arith.constant 5 : i32
    %213 = arith.shrsi %212, %c5_i32_112 : i32
    %214 = arith.index_cast %213 : i32 to index
    %215 = memref.load %arg2[%214] : memref<2xi32, #tpu.memory_space<smem>>
    %c31_i32_113 = arith.constant 31 : i32
    %216 = arith.andi %212, %c31_i32_113 : i32
    %217 = arith.shrsi %215, %216 : i32
    %c1_i32_114 = arith.constant 1 : i32
    %218 = arith.andi %217, %c1_i32_114 : i32
    %c19_115 = arith.constant 19 : index
    %219 = memref.load %arg3[%c19_115] : memref<56xi32, #tpu.memory_space<smem>>
    memref.store %218, %arg3[%c19_115] : memref<56xi32, #tpu.memory_space<smem>>
    %c20 = arith.constant 20 : index
    %220 = memref.load %arg0[%c20] : memref<56xi32, #tpu.memory_space<smem>>
    %c8_i32_116 = arith.constant 8 : i32
    %221 = arith.muli %220, %c8_i32_116 : i32
    %c20_117 = arith.constant 20 : index
    %222 = memref.load %arg1[%c20_117] : memref<56xi32, #tpu.memory_space<smem>>
    %223 = arith.addi %221, %222 : i32
    %c5_i32_118 = arith.constant 5 : i32
    %224 = arith.shrsi %223, %c5_i32_118 : i32
    %225 = arith.index_cast %224 : i32 to index
    %226 = memref.load %arg2[%225] : memref<2xi32, #tpu.memory_space<smem>>
    %c31_i32_119 = arith.constant 31 : i32
    %227 = arith.andi %223, %c31_i32_119 : i32
    %228 = arith.shrsi %226, %227 : i32
    %c1_i32_120 = arith.constant 1 : i32
    %229 = arith.andi %228, %c1_i32_120 : i32
    %c20_121 = arith.constant 20 : index
    %230 = memref.load %arg3[%c20_121] : memref<56xi32, #tpu.memory_space<smem>>
    memref.store %229, %arg3[%c20_121] : memref<56xi32, #tpu.memory_space<smem>>
    %c21 = arith.constant 21 : index
    %231 = memref.load %arg0[%c21] : memref<56xi32, #tpu.memory_space<smem>>
    %c8_i32_122 = arith.constant 8 : i32
    %232 = arith.muli %231, %c8_i32_122 : i32
    %c21_123 = arith.constant 21 : index
    %233 = memref.load %arg1[%c21_123] : memref<56xi32, #tpu.memory_space<smem>>
    %234 = arith.addi %232, %233 : i32
    %c5_i32_124 = arith.constant 5 : i32
    %235 = arith.shrsi %234, %c5_i32_124 : i32
    %236 = arith.index_cast %235 : i32 to index
    %237 = memref.load %arg2[%236] : memref<2xi32, #tpu.memory_space<smem>>
    %c31_i32_125 = arith.constant 31 : i32
    %238 = arith.andi %234, %c31_i32_125 : i32
    %239 = arith.shrsi %237, %238 : i32
    %c1_i32_126 = arith.constant 1 : i32
    %240 = arith.andi %239, %c1_i32_126 : i32
    %c21_127 = arith.constant 21 : index
    %241 = memref.load %arg3[%c21_127] : memref<56xi32, #tpu.memory_space<smem>>
    memref.store %240, %arg3[%c21_127] : memref<56xi32, #tpu.memory_space<smem>>
    %c22 = arith.constant 22 : index
    %242 = memref.load %arg0[%c22] : memref<56xi32, #tpu.memory_space<smem>>
    %c8_i32_128 = arith.constant 8 : i32
    %243 = arith.muli %242, %c8_i32_128 : i32
    %c22_129 = arith.constant 22 : index
    %244 = memref.load %arg1[%c22_129] : memref<56xi32, #tpu.memory_space<smem>>
    %245 = arith.addi %243, %244 : i32
    %c5_i32_130 = arith.constant 5 : i32
    %246 = arith.shrsi %245, %c5_i32_130 : i32
    %247 = arith.index_cast %246 : i32 to index
    %248 = memref.load %arg2[%247] : memref<2xi32, #tpu.memory_space<smem>>
    %c31_i32_131 = arith.constant 31 : i32
    %249 = arith.andi %245, %c31_i32_131 : i32
    %250 = arith.shrsi %248, %249 : i32
    %c1_i32_132 = arith.constant 1 : i32
    %251 = arith.andi %250, %c1_i32_132 : i32
    %c22_133 = arith.constant 22 : index
    %252 = memref.load %arg3[%c22_133] : memref<56xi32, #tpu.memory_space<smem>>
    memref.store %251, %arg3[%c22_133] : memref<56xi32, #tpu.memory_space<smem>>
    %c23 = arith.constant 23 : index
    %253 = memref.load %arg0[%c23] : memref<56xi32, #tpu.memory_space<smem>>
    %c8_i32_134 = arith.constant 8 : i32
    %254 = arith.muli %253, %c8_i32_134 : i32
    %c23_135 = arith.constant 23 : index
    %255 = memref.load %arg1[%c23_135] : memref<56xi32, #tpu.memory_space<smem>>
    %256 = arith.addi %254, %255 : i32
    %c5_i32_136 = arith.constant 5 : i32
    %257 = arith.shrsi %256, %c5_i32_136 : i32
    %258 = arith.index_cast %257 : i32 to index
    %259 = memref.load %arg2[%258] : memref<2xi32, #tpu.memory_space<smem>>
    %c31_i32_137 = arith.constant 31 : i32
    %260 = arith.andi %256, %c31_i32_137 : i32
    %261 = arith.shrsi %259, %260 : i32
    %c1_i32_138 = arith.constant 1 : i32
    %262 = arith.andi %261, %c1_i32_138 : i32
    %c23_139 = arith.constant 23 : index
    %263 = memref.load %arg3[%c23_139] : memref<56xi32, #tpu.memory_space<smem>>
    memref.store %262, %arg3[%c23_139] : memref<56xi32, #tpu.memory_space<smem>>
    %c24 = arith.constant 24 : index
    %264 = memref.load %arg0[%c24] : memref<56xi32, #tpu.memory_space<smem>>
    %c8_i32_140 = arith.constant 8 : i32
    %265 = arith.muli %264, %c8_i32_140 : i32
    %c24_141 = arith.constant 24 : index
    %266 = memref.load %arg1[%c24_141] : memref<56xi32, #tpu.memory_space<smem>>
    %267 = arith.addi %265, %266 : i32
    %c5_i32_142 = arith.constant 5 : i32
    %268 = arith.shrsi %267, %c5_i32_142 : i32
    %269 = arith.index_cast %268 : i32 to index
    %270 = memref.load %arg2[%269] : memref<2xi32, #tpu.memory_space<smem>>
    %c31_i32_143 = arith.constant 31 : i32
    %271 = arith.andi %267, %c31_i32_143 : i32
    %272 = arith.shrsi %270, %271 : i32
    %c1_i32_144 = arith.constant 1 : i32
    %273 = arith.andi %272, %c1_i32_144 : i32
    %c24_145 = arith.constant 24 : index
    %274 = memref.load %arg3[%c24_145] : memref<56xi32, #tpu.memory_space<smem>>
    memref.store %273, %arg3[%c24_145] : memref<56xi32, #tpu.memory_space<smem>>
    %c25 = arith.constant 25 : index
    %275 = memref.load %arg0[%c25] : memref<56xi32, #tpu.memory_space<smem>>
    %c8_i32_146 = arith.constant 8 : i32
    %276 = arith.muli %275, %c8_i32_146 : i32
    %c25_147 = arith.constant 25 : index
    %277 = memref.load %arg1[%c25_147] : memref<56xi32, #tpu.memory_space<smem>>
    %278 = arith.addi %276, %277 : i32
    %c5_i32_148 = arith.constant 5 : i32
    %279 = arith.shrsi %278, %c5_i32_148 : i32
    %280 = arith.index_cast %279 : i32 to index
    %281 = memref.load %arg2[%280] : memref<2xi32, #tpu.memory_space<smem>>
    %c31_i32_149 = arith.constant 31 : i32
    %282 = arith.andi %278, %c31_i32_149 : i32
    %283 = arith.shrsi %281, %282 : i32
    %c1_i32_150 = arith.constant 1 : i32
    %284 = arith.andi %283, %c1_i32_150 : i32
    %c25_151 = arith.constant 25 : index
    %285 = memref.load %arg3[%c25_151] : memref<56xi32, #tpu.memory_space<smem>>
    memref.store %284, %arg3[%c25_151] : memref<56xi32, #tpu.memory_space<smem>>
    %c26 = arith.constant 26 : index
    %286 = memref.load %arg0[%c26] : memref<56xi32, #tpu.memory_space<smem>>
    %c8_i32_152 = arith.constant 8 : i32
    %287 = arith.muli %286, %c8_i32_152 : i32
    %c26_153 = arith.constant 26 : index
    %288 = memref.load %arg1[%c26_153] : memref<56xi32, #tpu.memory_space<smem>>
    %289 = arith.addi %287, %288 : i32
    %c5_i32_154 = arith.constant 5 : i32
    %290 = arith.shrsi %289, %c5_i32_154 : i32
    %291 = arith.index_cast %290 : i32 to index
    %292 = memref.load %arg2[%291] : memref<2xi32, #tpu.memory_space<smem>>
    %c31_i32_155 = arith.constant 31 : i32
    %293 = arith.andi %289, %c31_i32_155 : i32
    %294 = arith.shrsi %292, %293 : i32
    %c1_i32_156 = arith.constant 1 : i32
    %295 = arith.andi %294, %c1_i32_156 : i32
    %c26_157 = arith.constant 26 : index
    %296 = memref.load %arg3[%c26_157] : memref<56xi32, #tpu.memory_space<smem>>
    memref.store %295, %arg3[%c26_157] : memref<56xi32, #tpu.memory_space<smem>>
    %c27 = arith.constant 27 : index
    %297 = memref.load %arg0[%c27] : memref<56xi32, #tpu.memory_space<smem>>
    %c8_i32_158 = arith.constant 8 : i32
    %298 = arith.muli %297, %c8_i32_158 : i32
    %c27_159 = arith.constant 27 : index
    %299 = memref.load %arg1[%c27_159] : memref<56xi32, #tpu.memory_space<smem>>
    %300 = arith.addi %298, %299 : i32
    %c5_i32_160 = arith.constant 5 : i32
    %301 = arith.shrsi %300, %c5_i32_160 : i32
    %302 = arith.index_cast %301 : i32 to index
    %303 = memref.load %arg2[%302] : memref<2xi32, #tpu.memory_space<smem>>
    %c31_i32_161 = arith.constant 31 : i32
    %304 = arith.andi %300, %c31_i32_161 : i32
    %305 = arith.shrsi %303, %304 : i32
    %c1_i32_162 = arith.constant 1 : i32
    %306 = arith.andi %305, %c1_i32_162 : i32
    %c27_163 = arith.constant 27 : index
    %307 = memref.load %arg3[%c27_163] : memref<56xi32, #tpu.memory_space<smem>>
    memref.store %306, %arg3[%c27_163] : memref<56xi32, #tpu.memory_space<smem>>
    %c28 = arith.constant 28 : index
    %308 = memref.load %arg0[%c28] : memref<56xi32, #tpu.memory_space<smem>>
    %c8_i32_164 = arith.constant 8 : i32
    %309 = arith.muli %308, %c8_i32_164 : i32
    %c28_165 = arith.constant 28 : index
    %310 = memref.load %arg1[%c28_165] : memref<56xi32, #tpu.memory_space<smem>>
    %311 = arith.addi %309, %310 : i32
    %c5_i32_166 = arith.constant 5 : i32
    %312 = arith.shrsi %311, %c5_i32_166 : i32
    %313 = arith.index_cast %312 : i32 to index
    %314 = memref.load %arg2[%313] : memref<2xi32, #tpu.memory_space<smem>>
    %c31_i32_167 = arith.constant 31 : i32
    %315 = arith.andi %311, %c31_i32_167 : i32
    %316 = arith.shrsi %314, %315 : i32
    %c1_i32_168 = arith.constant 1 : i32
    %317 = arith.andi %316, %c1_i32_168 : i32
    %c28_169 = arith.constant 28 : index
    %318 = memref.load %arg3[%c28_169] : memref<56xi32, #tpu.memory_space<smem>>
    memref.store %317, %arg3[%c28_169] : memref<56xi32, #tpu.memory_space<smem>>
    %c29 = arith.constant 29 : index
    %319 = memref.load %arg0[%c29] : memref<56xi32, #tpu.memory_space<smem>>
    %c8_i32_170 = arith.constant 8 : i32
    %320 = arith.muli %319, %c8_i32_170 : i32
    %c29_171 = arith.constant 29 : index
    %321 = memref.load %arg1[%c29_171] : memref<56xi32, #tpu.memory_space<smem>>
    %322 = arith.addi %320, %321 : i32
    %c5_i32_172 = arith.constant 5 : i32
    %323 = arith.shrsi %322, %c5_i32_172 : i32
    %324 = arith.index_cast %323 : i32 to index
    %325 = memref.load %arg2[%324] : memref<2xi32, #tpu.memory_space<smem>>
    %c31_i32_173 = arith.constant 31 : i32
    %326 = arith.andi %322, %c31_i32_173 : i32
    %327 = arith.shrsi %325, %326 : i32
    %c1_i32_174 = arith.constant 1 : i32
    %328 = arith.andi %327, %c1_i32_174 : i32
    %c29_175 = arith.constant 29 : index
    %329 = memref.load %arg3[%c29_175] : memref<56xi32, #tpu.memory_space<smem>>
    memref.store %328, %arg3[%c29_175] : memref<56xi32, #tpu.memory_space<smem>>
    %c30 = arith.constant 30 : index
    %330 = memref.load %arg0[%c30] : memref<56xi32, #tpu.memory_space<smem>>
    %c8_i32_176 = arith.constant 8 : i32
    %331 = arith.muli %330, %c8_i32_176 : i32
    %c30_177 = arith.constant 30 : index
    %332 = memref.load %arg1[%c30_177] : memref<56xi32, #tpu.memory_space<smem>>
    %333 = arith.addi %331, %332 : i32
    %c5_i32_178 = arith.constant 5 : i32
    %334 = arith.shrsi %333, %c5_i32_178 : i32
    %335 = arith.index_cast %334 : i32 to index
    %336 = memref.load %arg2[%335] : memref<2xi32, #tpu.memory_space<smem>>
    %c31_i32_179 = arith.constant 31 : i32
    %337 = arith.andi %333, %c31_i32_179 : i32
    %338 = arith.shrsi %336, %337 : i32
    %c1_i32_180 = arith.constant 1 : i32
    %339 = arith.andi %338, %c1_i32_180 : i32
    %c30_181 = arith.constant 30 : index
    %340 = memref.load %arg3[%c30_181] : memref<56xi32, #tpu.memory_space<smem>>
    memref.store %339, %arg3[%c30_181] : memref<56xi32, #tpu.memory_space<smem>>
    %c31 = arith.constant 31 : index
    %341 = memref.load %arg0[%c31] : memref<56xi32, #tpu.memory_space<smem>>
    %c8_i32_182 = arith.constant 8 : i32
    %342 = arith.muli %341, %c8_i32_182 : i32
    %c31_183 = arith.constant 31 : index
    %343 = memref.load %arg1[%c31_183] : memref<56xi32, #tpu.memory_space<smem>>
    %344 = arith.addi %342, %343 : i32
    %c5_i32_184 = arith.constant 5 : i32
    %345 = arith.shrsi %344, %c5_i32_184 : i32
    %346 = arith.index_cast %345 : i32 to index
    %347 = memref.load %arg2[%346] : memref<2xi32, #tpu.memory_space<smem>>
    %c31_i32_185 = arith.constant 31 : i32
    %348 = arith.andi %344, %c31_i32_185 : i32
    %349 = arith.shrsi %347, %348 : i32
    %c1_i32_186 = arith.constant 1 : i32
    %350 = arith.andi %349, %c1_i32_186 : i32
    %c31_187 = arith.constant 31 : index
    %351 = memref.load %arg3[%c31_187] : memref<56xi32, #tpu.memory_space<smem>>
    memref.store %350, %arg3[%c31_187] : memref<56xi32, #tpu.memory_space<smem>>
    %c32 = arith.constant 32 : index
    %352 = memref.load %arg0[%c32] : memref<56xi32, #tpu.memory_space<smem>>
    %c8_i32_188 = arith.constant 8 : i32
    %353 = arith.muli %352, %c8_i32_188 : i32
    %c32_189 = arith.constant 32 : index
    %354 = memref.load %arg1[%c32_189] : memref<56xi32, #tpu.memory_space<smem>>
    %355 = arith.addi %353, %354 : i32
    %c5_i32_190 = arith.constant 5 : i32
    %356 = arith.shrsi %355, %c5_i32_190 : i32
    %357 = arith.index_cast %356 : i32 to index
    %358 = memref.load %arg2[%357] : memref<2xi32, #tpu.memory_space<smem>>
    %c31_i32_191 = arith.constant 31 : i32
    %359 = arith.andi %355, %c31_i32_191 : i32
    %360 = arith.shrsi %358, %359 : i32
    %c1_i32_192 = arith.constant 1 : i32
    %361 = arith.andi %360, %c1_i32_192 : i32
    %c32_193 = arith.constant 32 : index
    %362 = memref.load %arg3[%c32_193] : memref<56xi32, #tpu.memory_space<smem>>
    memref.store %361, %arg3[%c32_193] : memref<56xi32, #tpu.memory_space<smem>>
    %c33 = arith.constant 33 : index
    %363 = memref.load %arg0[%c33] : memref<56xi32, #tpu.memory_space<smem>>
    %c8_i32_194 = arith.constant 8 : i32
    %364 = arith.muli %363, %c8_i32_194 : i32
    %c33_195 = arith.constant 33 : index
    %365 = memref.load %arg1[%c33_195] : memref<56xi32, #tpu.memory_space<smem>>
    %366 = arith.addi %364, %365 : i32
    %c5_i32_196 = arith.constant 5 : i32
    %367 = arith.shrsi %366, %c5_i32_196 : i32
    %368 = arith.index_cast %367 : i32 to index
    %369 = memref.load %arg2[%368] : memref<2xi32, #tpu.memory_space<smem>>
    %c31_i32_197 = arith.constant 31 : i32
    %370 = arith.andi %366, %c31_i32_197 : i32
    %371 = arith.shrsi %369, %370 : i32
    %c1_i32_198 = arith.constant 1 : i32
    %372 = arith.andi %371, %c1_i32_198 : i32
    %c33_199 = arith.constant 33 : index
    %373 = memref.load %arg3[%c33_199] : memref<56xi32, #tpu.memory_space<smem>>
    memref.store %372, %arg3[%c33_199] : memref<56xi32, #tpu.memory_space<smem>>
    %c34 = arith.constant 34 : index
    %374 = memref.load %arg0[%c34] : memref<56xi32, #tpu.memory_space<smem>>
    %c8_i32_200 = arith.constant 8 : i32
    %375 = arith.muli %374, %c8_i32_200 : i32
    %c34_201 = arith.constant 34 : index
    %376 = memref.load %arg1[%c34_201] : memref<56xi32, #tpu.memory_space<smem>>
    %377 = arith.addi %375, %376 : i32
    %c5_i32_202 = arith.constant 5 : i32
    %378 = arith.shrsi %377, %c5_i32_202 : i32
    %379 = arith.index_cast %378 : i32 to index
    %380 = memref.load %arg2[%379] : memref<2xi32, #tpu.memory_space<smem>>
    %c31_i32_203 = arith.constant 31 : i32
    %381 = arith.andi %377, %c31_i32_203 : i32
    %382 = arith.shrsi %380, %381 : i32
    %c1_i32_204 = arith.constant 1 : i32
    %383 = arith.andi %382, %c1_i32_204 : i32
    %c34_205 = arith.constant 34 : index
    %384 = memref.load %arg3[%c34_205] : memref<56xi32, #tpu.memory_space<smem>>
    memref.store %383, %arg3[%c34_205] : memref<56xi32, #tpu.memory_space<smem>>
    %c35 = arith.constant 35 : index
    %385 = memref.load %arg0[%c35] : memref<56xi32, #tpu.memory_space<smem>>
    %c8_i32_206 = arith.constant 8 : i32
    %386 = arith.muli %385, %c8_i32_206 : i32
    %c35_207 = arith.constant 35 : index
    %387 = memref.load %arg1[%c35_207] : memref<56xi32, #tpu.memory_space<smem>>
    %388 = arith.addi %386, %387 : i32
    %c5_i32_208 = arith.constant 5 : i32
    %389 = arith.shrsi %388, %c5_i32_208 : i32
    %390 = arith.index_cast %389 : i32 to index
    %391 = memref.load %arg2[%390] : memref<2xi32, #tpu.memory_space<smem>>
    %c31_i32_209 = arith.constant 31 : i32
    %392 = arith.andi %388, %c31_i32_209 : i32
    %393 = arith.shrsi %391, %392 : i32
    %c1_i32_210 = arith.constant 1 : i32
    %394 = arith.andi %393, %c1_i32_210 : i32
    %c35_211 = arith.constant 35 : index
    %395 = memref.load %arg3[%c35_211] : memref<56xi32, #tpu.memory_space<smem>>
    memref.store %394, %arg3[%c35_211] : memref<56xi32, #tpu.memory_space<smem>>
    %c36 = arith.constant 36 : index
    %396 = memref.load %arg0[%c36] : memref<56xi32, #tpu.memory_space<smem>>
    %c8_i32_212 = arith.constant 8 : i32
    %397 = arith.muli %396, %c8_i32_212 : i32
    %c36_213 = arith.constant 36 : index
    %398 = memref.load %arg1[%c36_213] : memref<56xi32, #tpu.memory_space<smem>>
    %399 = arith.addi %397, %398 : i32
    %c5_i32_214 = arith.constant 5 : i32
    %400 = arith.shrsi %399, %c5_i32_214 : i32
    %401 = arith.index_cast %400 : i32 to index
    %402 = memref.load %arg2[%401] : memref<2xi32, #tpu.memory_space<smem>>
    %c31_i32_215 = arith.constant 31 : i32
    %403 = arith.andi %399, %c31_i32_215 : i32
    %404 = arith.shrsi %402, %403 : i32
    %c1_i32_216 = arith.constant 1 : i32
    %405 = arith.andi %404, %c1_i32_216 : i32
    %c36_217 = arith.constant 36 : index
    %406 = memref.load %arg3[%c36_217] : memref<56xi32, #tpu.memory_space<smem>>
    memref.store %405, %arg3[%c36_217] : memref<56xi32, #tpu.memory_space<smem>>
    %c37 = arith.constant 37 : index
    %407 = memref.load %arg0[%c37] : memref<56xi32, #tpu.memory_space<smem>>
    %c8_i32_218 = arith.constant 8 : i32
    %408 = arith.muli %407, %c8_i32_218 : i32
    %c37_219 = arith.constant 37 : index
    %409 = memref.load %arg1[%c37_219] : memref<56xi32, #tpu.memory_space<smem>>
    %410 = arith.addi %408, %409 : i32
    %c5_i32_220 = arith.constant 5 : i32
    %411 = arith.shrsi %410, %c5_i32_220 : i32
    %412 = arith.index_cast %411 : i32 to index
    %413 = memref.load %arg2[%412] : memref<2xi32, #tpu.memory_space<smem>>
    %c31_i32_221 = arith.constant 31 : i32
    %414 = arith.andi %410, %c31_i32_221 : i32
    %415 = arith.shrsi %413, %414 : i32
    %c1_i32_222 = arith.constant 1 : i32
    %416 = arith.andi %415, %c1_i32_222 : i32
    %c37_223 = arith.constant 37 : index
    %417 = memref.load %arg3[%c37_223] : memref<56xi32, #tpu.memory_space<smem>>
    memref.store %416, %arg3[%c37_223] : memref<56xi32, #tpu.memory_space<smem>>
    %c38 = arith.constant 38 : index
    %418 = memref.load %arg0[%c38] : memref<56xi32, #tpu.memory_space<smem>>
    %c8_i32_224 = arith.constant 8 : i32
    %419 = arith.muli %418, %c8_i32_224 : i32
    %c38_225 = arith.constant 38 : index
    %420 = memref.load %arg1[%c38_225] : memref<56xi32, #tpu.memory_space<smem>>
    %421 = arith.addi %419, %420 : i32
    %c5_i32_226 = arith.constant 5 : i32
    %422 = arith.shrsi %421, %c5_i32_226 : i32
    %423 = arith.index_cast %422 : i32 to index
    %424 = memref.load %arg2[%423] : memref<2xi32, #tpu.memory_space<smem>>
    %c31_i32_227 = arith.constant 31 : i32
    %425 = arith.andi %421, %c31_i32_227 : i32
    %426 = arith.shrsi %424, %425 : i32
    %c1_i32_228 = arith.constant 1 : i32
    %427 = arith.andi %426, %c1_i32_228 : i32
    %c38_229 = arith.constant 38 : index
    %428 = memref.load %arg3[%c38_229] : memref<56xi32, #tpu.memory_space<smem>>
    memref.store %427, %arg3[%c38_229] : memref<56xi32, #tpu.memory_space<smem>>
    %c39 = arith.constant 39 : index
    %429 = memref.load %arg0[%c39] : memref<56xi32, #tpu.memory_space<smem>>
    %c8_i32_230 = arith.constant 8 : i32
    %430 = arith.muli %429, %c8_i32_230 : i32
    %c39_231 = arith.constant 39 : index
    %431 = memref.load %arg1[%c39_231] : memref<56xi32, #tpu.memory_space<smem>>
    %432 = arith.addi %430, %431 : i32
    %c5_i32_232 = arith.constant 5 : i32
    %433 = arith.shrsi %432, %c5_i32_232 : i32
    %434 = arith.index_cast %433 : i32 to index
    %435 = memref.load %arg2[%434] : memref<2xi32, #tpu.memory_space<smem>>
    %c31_i32_233 = arith.constant 31 : i32
    %436 = arith.andi %432, %c31_i32_233 : i32
    %437 = arith.shrsi %435, %436 : i32
    %c1_i32_234 = arith.constant 1 : i32
    %438 = arith.andi %437, %c1_i32_234 : i32
    %c39_235 = arith.constant 39 : index
    %439 = memref.load %arg3[%c39_235] : memref<56xi32, #tpu.memory_space<smem>>
    memref.store %438, %arg3[%c39_235] : memref<56xi32, #tpu.memory_space<smem>>
    %c40 = arith.constant 40 : index
    %440 = memref.load %arg0[%c40] : memref<56xi32, #tpu.memory_space<smem>>
    %c8_i32_236 = arith.constant 8 : i32
    %441 = arith.muli %440, %c8_i32_236 : i32
    %c40_237 = arith.constant 40 : index
    %442 = memref.load %arg1[%c40_237] : memref<56xi32, #tpu.memory_space<smem>>
    %443 = arith.addi %441, %442 : i32
    %c5_i32_238 = arith.constant 5 : i32
    %444 = arith.shrsi %443, %c5_i32_238 : i32
    %445 = arith.index_cast %444 : i32 to index
    %446 = memref.load %arg2[%445] : memref<2xi32, #tpu.memory_space<smem>>
    %c31_i32_239 = arith.constant 31 : i32
    %447 = arith.andi %443, %c31_i32_239 : i32
    %448 = arith.shrsi %446, %447 : i32
    %c1_i32_240 = arith.constant 1 : i32
    %449 = arith.andi %448, %c1_i32_240 : i32
    %c40_241 = arith.constant 40 : index
    %450 = memref.load %arg3[%c40_241] : memref<56xi32, #tpu.memory_space<smem>>
    memref.store %449, %arg3[%c40_241] : memref<56xi32, #tpu.memory_space<smem>>
    %c41 = arith.constant 41 : index
    %451 = memref.load %arg0[%c41] : memref<56xi32, #tpu.memory_space<smem>>
    %c8_i32_242 = arith.constant 8 : i32
    %452 = arith.muli %451, %c8_i32_242 : i32
    %c41_243 = arith.constant 41 : index
    %453 = memref.load %arg1[%c41_243] : memref<56xi32, #tpu.memory_space<smem>>
    %454 = arith.addi %452, %453 : i32
    %c5_i32_244 = arith.constant 5 : i32
    %455 = arith.shrsi %454, %c5_i32_244 : i32
    %456 = arith.index_cast %455 : i32 to index
    %457 = memref.load %arg2[%456] : memref<2xi32, #tpu.memory_space<smem>>
    %c31_i32_245 = arith.constant 31 : i32
    %458 = arith.andi %454, %c31_i32_245 : i32
    %459 = arith.shrsi %457, %458 : i32
    %c1_i32_246 = arith.constant 1 : i32
    %460 = arith.andi %459, %c1_i32_246 : i32
    %c41_247 = arith.constant 41 : index
    %461 = memref.load %arg3[%c41_247] : memref<56xi32, #tpu.memory_space<smem>>
    memref.store %460, %arg3[%c41_247] : memref<56xi32, #tpu.memory_space<smem>>
    %c42 = arith.constant 42 : index
    %462 = memref.load %arg0[%c42] : memref<56xi32, #tpu.memory_space<smem>>
    %c8_i32_248 = arith.constant 8 : i32
    %463 = arith.muli %462, %c8_i32_248 : i32
    %c42_249 = arith.constant 42 : index
    %464 = memref.load %arg1[%c42_249] : memref<56xi32, #tpu.memory_space<smem>>
    %465 = arith.addi %463, %464 : i32
    %c5_i32_250 = arith.constant 5 : i32
    %466 = arith.shrsi %465, %c5_i32_250 : i32
    %467 = arith.index_cast %466 : i32 to index
    %468 = memref.load %arg2[%467] : memref<2xi32, #tpu.memory_space<smem>>
    %c31_i32_251 = arith.constant 31 : i32
    %469 = arith.andi %465, %c31_i32_251 : i32
    %470 = arith.shrsi %468, %469 : i32
    %c1_i32_252 = arith.constant 1 : i32
    %471 = arith.andi %470, %c1_i32_252 : i32
    %c42_253 = arith.constant 42 : index
    %472 = memref.load %arg3[%c42_253] : memref<56xi32, #tpu.memory_space<smem>>
    memref.store %471, %arg3[%c42_253] : memref<56xi32, #tpu.memory_space<smem>>
    %c43 = arith.constant 43 : index
    %473 = memref.load %arg0[%c43] : memref<56xi32, #tpu.memory_space<smem>>
    %c8_i32_254 = arith.constant 8 : i32
    %474 = arith.muli %473, %c8_i32_254 : i32
    %c43_255 = arith.constant 43 : index
    %475 = memref.load %arg1[%c43_255] : memref<56xi32, #tpu.memory_space<smem>>
    %476 = arith.addi %474, %475 : i32
    %c5_i32_256 = arith.constant 5 : i32
    %477 = arith.shrsi %476, %c5_i32_256 : i32
    %478 = arith.index_cast %477 : i32 to index
    %479 = memref.load %arg2[%478] : memref<2xi32, #tpu.memory_space<smem>>
    %c31_i32_257 = arith.constant 31 : i32
    %480 = arith.andi %476, %c31_i32_257 : i32
    %481 = arith.shrsi %479, %480 : i32
    %c1_i32_258 = arith.constant 1 : i32
    %482 = arith.andi %481, %c1_i32_258 : i32
    %c43_259 = arith.constant 43 : index
    %483 = memref.load %arg3[%c43_259] : memref<56xi32, #tpu.memory_space<smem>>
    memref.store %482, %arg3[%c43_259] : memref<56xi32, #tpu.memory_space<smem>>
    %c44 = arith.constant 44 : index
    %484 = memref.load %arg0[%c44] : memref<56xi32, #tpu.memory_space<smem>>
    %c8_i32_260 = arith.constant 8 : i32
    %485 = arith.muli %484, %c8_i32_260 : i32
    %c44_261 = arith.constant 44 : index
    %486 = memref.load %arg1[%c44_261] : memref<56xi32, #tpu.memory_space<smem>>
    %487 = arith.addi %485, %486 : i32
    %c5_i32_262 = arith.constant 5 : i32
    %488 = arith.shrsi %487, %c5_i32_262 : i32
    %489 = arith.index_cast %488 : i32 to index
    %490 = memref.load %arg2[%489] : memref<2xi32, #tpu.memory_space<smem>>
    %c31_i32_263 = arith.constant 31 : i32
    %491 = arith.andi %487, %c31_i32_263 : i32
    %492 = arith.shrsi %490, %491 : i32
    %c1_i32_264 = arith.constant 1 : i32
    %493 = arith.andi %492, %c1_i32_264 : i32
    %c44_265 = arith.constant 44 : index
    %494 = memref.load %arg3[%c44_265] : memref<56xi32, #tpu.memory_space<smem>>
    memref.store %493, %arg3[%c44_265] : memref<56xi32, #tpu.memory_space<smem>>
    %c45 = arith.constant 45 : index
    %495 = memref.load %arg0[%c45] : memref<56xi32, #tpu.memory_space<smem>>
    %c8_i32_266 = arith.constant 8 : i32
    %496 = arith.muli %495, %c8_i32_266 : i32
    %c45_267 = arith.constant 45 : index
    %497 = memref.load %arg1[%c45_267] : memref<56xi32, #tpu.memory_space<smem>>
    %498 = arith.addi %496, %497 : i32
    %c5_i32_268 = arith.constant 5 : i32
    %499 = arith.shrsi %498, %c5_i32_268 : i32
    %500 = arith.index_cast %499 : i32 to index
    %501 = memref.load %arg2[%500] : memref<2xi32, #tpu.memory_space<smem>>
    %c31_i32_269 = arith.constant 31 : i32
    %502 = arith.andi %498, %c31_i32_269 : i32
    %503 = arith.shrsi %501, %502 : i32
    %c1_i32_270 = arith.constant 1 : i32
    %504 = arith.andi %503, %c1_i32_270 : i32
    %c45_271 = arith.constant 45 : index
    %505 = memref.load %arg3[%c45_271] : memref<56xi32, #tpu.memory_space<smem>>
    memref.store %504, %arg3[%c45_271] : memref<56xi32, #tpu.memory_space<smem>>
    %c46 = arith.constant 46 : index
    %506 = memref.load %arg0[%c46] : memref<56xi32, #tpu.memory_space<smem>>
    %c8_i32_272 = arith.constant 8 : i32
    %507 = arith.muli %506, %c8_i32_272 : i32
    %c46_273 = arith.constant 46 : index
    %508 = memref.load %arg1[%c46_273] : memref<56xi32, #tpu.memory_space<smem>>
    %509 = arith.addi %507, %508 : i32
    %c5_i32_274 = arith.constant 5 : i32
    %510 = arith.shrsi %509, %c5_i32_274 : i32
    %511 = arith.index_cast %510 : i32 to index
    %512 = memref.load %arg2[%511] : memref<2xi32, #tpu.memory_space<smem>>
    %c31_i32_275 = arith.constant 31 : i32
    %513 = arith.andi %509, %c31_i32_275 : i32
    %514 = arith.shrsi %512, %513 : i32
    %c1_i32_276 = arith.constant 1 : i32
    %515 = arith.andi %514, %c1_i32_276 : i32
    %c46_277 = arith.constant 46 : index
    %516 = memref.load %arg3[%c46_277] : memref<56xi32, #tpu.memory_space<smem>>
    memref.store %515, %arg3[%c46_277] : memref<56xi32, #tpu.memory_space<smem>>
    %c47 = arith.constant 47 : index
    %517 = memref.load %arg0[%c47] : memref<56xi32, #tpu.memory_space<smem>>
    %c8_i32_278 = arith.constant 8 : i32
    %518 = arith.muli %517, %c8_i32_278 : i32
    %c47_279 = arith.constant 47 : index
    %519 = memref.load %arg1[%c47_279] : memref<56xi32, #tpu.memory_space<smem>>
    %520 = arith.addi %518, %519 : i32
    %c5_i32_280 = arith.constant 5 : i32
    %521 = arith.shrsi %520, %c5_i32_280 : i32
    %522 = arith.index_cast %521 : i32 to index
    %523 = memref.load %arg2[%522] : memref<2xi32, #tpu.memory_space<smem>>
    %c31_i32_281 = arith.constant 31 : i32
    %524 = arith.andi %520, %c31_i32_281 : i32
    %525 = arith.shrsi %523, %524 : i32
    %c1_i32_282 = arith.constant 1 : i32
    %526 = arith.andi %525, %c1_i32_282 : i32
    %c47_283 = arith.constant 47 : index
    %527 = memref.load %arg3[%c47_283] : memref<56xi32, #tpu.memory_space<smem>>
    memref.store %526, %arg3[%c47_283] : memref<56xi32, #tpu.memory_space<smem>>
    %c48 = arith.constant 48 : index
    %528 = memref.load %arg0[%c48] : memref<56xi32, #tpu.memory_space<smem>>
    %c8_i32_284 = arith.constant 8 : i32
    %529 = arith.muli %528, %c8_i32_284 : i32
    %c48_285 = arith.constant 48 : index
    %530 = memref.load %arg1[%c48_285] : memref<56xi32, #tpu.memory_space<smem>>
    %531 = arith.addi %529, %530 : i32
    %c5_i32_286 = arith.constant 5 : i32
    %532 = arith.shrsi %531, %c5_i32_286 : i32
    %533 = arith.index_cast %532 : i32 to index
    %534 = memref.load %arg2[%533] : memref<2xi32, #tpu.memory_space<smem>>
    %c31_i32_287 = arith.constant 31 : i32
    %535 = arith.andi %531, %c31_i32_287 : i32
    %536 = arith.shrsi %534, %535 : i32
    %c1_i32_288 = arith.constant 1 : i32
    %537 = arith.andi %536, %c1_i32_288 : i32
    %c48_289 = arith.constant 48 : index
    %538 = memref.load %arg3[%c48_289] : memref<56xi32, #tpu.memory_space<smem>>
    memref.store %537, %arg3[%c48_289] : memref<56xi32, #tpu.memory_space<smem>>
    %c49 = arith.constant 49 : index
    %539 = memref.load %arg0[%c49] : memref<56xi32, #tpu.memory_space<smem>>
    %c8_i32_290 = arith.constant 8 : i32
    %540 = arith.muli %539, %c8_i32_290 : i32
    %c49_291 = arith.constant 49 : index
    %541 = memref.load %arg1[%c49_291] : memref<56xi32, #tpu.memory_space<smem>>
    %542 = arith.addi %540, %541 : i32
    %c5_i32_292 = arith.constant 5 : i32
    %543 = arith.shrsi %542, %c5_i32_292 : i32
    %544 = arith.index_cast %543 : i32 to index
    %545 = memref.load %arg2[%544] : memref<2xi32, #tpu.memory_space<smem>>
    %c31_i32_293 = arith.constant 31 : i32
    %546 = arith.andi %542, %c31_i32_293 : i32
    %547 = arith.shrsi %545, %546 : i32
    %c1_i32_294 = arith.constant 1 : i32
    %548 = arith.andi %547, %c1_i32_294 : i32
    %c49_295 = arith.constant 49 : index
    %549 = memref.load %arg3[%c49_295] : memref<56xi32, #tpu.memory_space<smem>>
    memref.store %548, %arg3[%c49_295] : memref<56xi32, #tpu.memory_space<smem>>
    %c50 = arith.constant 50 : index
    %550 = memref.load %arg0[%c50] : memref<56xi32, #tpu.memory_space<smem>>
    %c8_i32_296 = arith.constant 8 : i32
    %551 = arith.muli %550, %c8_i32_296 : i32
    %c50_297 = arith.constant 50 : index
    %552 = memref.load %arg1[%c50_297] : memref<56xi32, #tpu.memory_space<smem>>
    %553 = arith.addi %551, %552 : i32
    %c5_i32_298 = arith.constant 5 : i32
    %554 = arith.shrsi %553, %c5_i32_298 : i32
    %555 = arith.index_cast %554 : i32 to index
    %556 = memref.load %arg2[%555] : memref<2xi32, #tpu.memory_space<smem>>
    %c31_i32_299 = arith.constant 31 : i32
    %557 = arith.andi %553, %c31_i32_299 : i32
    %558 = arith.shrsi %556, %557 : i32
    %c1_i32_300 = arith.constant 1 : i32
    %559 = arith.andi %558, %c1_i32_300 : i32
    %c50_301 = arith.constant 50 : index
    %560 = memref.load %arg3[%c50_301] : memref<56xi32, #tpu.memory_space<smem>>
    memref.store %559, %arg3[%c50_301] : memref<56xi32, #tpu.memory_space<smem>>
    %c51 = arith.constant 51 : index
    %561 = memref.load %arg0[%c51] : memref<56xi32, #tpu.memory_space<smem>>
    %c8_i32_302 = arith.constant 8 : i32
    %562 = arith.muli %561, %c8_i32_302 : i32
    %c51_303 = arith.constant 51 : index
    %563 = memref.load %arg1[%c51_303] : memref<56xi32, #tpu.memory_space<smem>>
    %564 = arith.addi %562, %563 : i32
    %c5_i32_304 = arith.constant 5 : i32
    %565 = arith.shrsi %564, %c5_i32_304 : i32
    %566 = arith.index_cast %565 : i32 to index
    %567 = memref.load %arg2[%566] : memref<2xi32, #tpu.memory_space<smem>>
    %c31_i32_305 = arith.constant 31 : i32
    %568 = arith.andi %564, %c31_i32_305 : i32
    %569 = arith.shrsi %567, %568 : i32
    %c1_i32_306 = arith.constant 1 : i32
    %570 = arith.andi %569, %c1_i32_306 : i32
    %c51_307 = arith.constant 51 : index
    %571 = memref.load %arg3[%c51_307] : memref<56xi32, #tpu.memory_space<smem>>
    memref.store %570, %arg3[%c51_307] : memref<56xi32, #tpu.memory_space<smem>>
    %c52 = arith.constant 52 : index
    %572 = memref.load %arg0[%c52] : memref<56xi32, #tpu.memory_space<smem>>
    %c8_i32_308 = arith.constant 8 : i32
    %573 = arith.muli %572, %c8_i32_308 : i32
    %c52_309 = arith.constant 52 : index
    %574 = memref.load %arg1[%c52_309] : memref<56xi32, #tpu.memory_space<smem>>
    %575 = arith.addi %573, %574 : i32
    %c5_i32_310 = arith.constant 5 : i32
    %576 = arith.shrsi %575, %c5_i32_310 : i32
    %577 = arith.index_cast %576 : i32 to index
    %578 = memref.load %arg2[%577] : memref<2xi32, #tpu.memory_space<smem>>
    %c31_i32_311 = arith.constant 31 : i32
    %579 = arith.andi %575, %c31_i32_311 : i32
    %580 = arith.shrsi %578, %579 : i32
    %c1_i32_312 = arith.constant 1 : i32
    %581 = arith.andi %580, %c1_i32_312 : i32
    %c52_313 = arith.constant 52 : index
    %582 = memref.load %arg3[%c52_313] : memref<56xi32, #tpu.memory_space<smem>>
    memref.store %581, %arg3[%c52_313] : memref<56xi32, #tpu.memory_space<smem>>
    %c53 = arith.constant 53 : index
    %583 = memref.load %arg0[%c53] : memref<56xi32, #tpu.memory_space<smem>>
    %c8_i32_314 = arith.constant 8 : i32
    %584 = arith.muli %583, %c8_i32_314 : i32
    %c53_315 = arith.constant 53 : index
    %585 = memref.load %arg1[%c53_315] : memref<56xi32, #tpu.memory_space<smem>>
    %586 = arith.addi %584, %585 : i32
    %c5_i32_316 = arith.constant 5 : i32
    %587 = arith.shrsi %586, %c5_i32_316 : i32
    %588 = arith.index_cast %587 : i32 to index
    %589 = memref.load %arg2[%588] : memref<2xi32, #tpu.memory_space<smem>>
    %c31_i32_317 = arith.constant 31 : i32
    %590 = arith.andi %586, %c31_i32_317 : i32
    %591 = arith.shrsi %589, %590 : i32
    %c1_i32_318 = arith.constant 1 : i32
    %592 = arith.andi %591, %c1_i32_318 : i32
    %c53_319 = arith.constant 53 : index
    %593 = memref.load %arg3[%c53_319] : memref<56xi32, #tpu.memory_space<smem>>
    memref.store %592, %arg3[%c53_319] : memref<56xi32, #tpu.memory_space<smem>>
    %c54 = arith.constant 54 : index
    %594 = memref.load %arg0[%c54] : memref<56xi32, #tpu.memory_space<smem>>
    %c8_i32_320 = arith.constant 8 : i32
    %595 = arith.muli %594, %c8_i32_320 : i32
    %c54_321 = arith.constant 54 : index
    %596 = memref.load %arg1[%c54_321] : memref<56xi32, #tpu.memory_space<smem>>
    %597 = arith.addi %595, %596 : i32
    %c5_i32_322 = arith.constant 5 : i32
    %598 = arith.shrsi %597, %c5_i32_322 : i32
    %599 = arith.index_cast %598 : i32 to index
    %600 = memref.load %arg2[%599] : memref<2xi32, #tpu.memory_space<smem>>
    %c31_i32_323 = arith.constant 31 : i32
    %601 = arith.andi %597, %c31_i32_323 : i32
    %602 = arith.shrsi %600, %601 : i32
    %c1_i32_324 = arith.constant 1 : i32
    %603 = arith.andi %602, %c1_i32_324 : i32
    %c54_325 = arith.constant 54 : index
    %604 = memref.load %arg3[%c54_325] : memref<56xi32, #tpu.memory_space<smem>>
    memref.store %603, %arg3[%c54_325] : memref<56xi32, #tpu.memory_space<smem>>
    %c55 = arith.constant 55 : index
    %605 = memref.load %arg0[%c55] : memref<56xi32, #tpu.memory_space<smem>>
    %c8_i32_326 = arith.constant 8 : i32
    %606 = arith.muli %605, %c8_i32_326 : i32
    %c55_327 = arith.constant 55 : index
    %607 = memref.load %arg1[%c55_327] : memref<56xi32, #tpu.memory_space<smem>>
    %608 = arith.addi %606, %607 : i32
    %c5_i32_328 = arith.constant 5 : i32
    %609 = arith.shrsi %608, %c5_i32_328 : i32
    %610 = arith.index_cast %609 : i32 to index
    %611 = memref.load %arg2[%610] : memref<2xi32, #tpu.memory_space<smem>>
    %c31_i32_329 = arith.constant 31 : i32
    %612 = arith.andi %608, %c31_i32_329 : i32
    %613 = arith.shrsi %611, %612 : i32
    %c1_i32_330 = arith.constant 1 : i32
    %614 = arith.andi %613, %c1_i32_330 : i32
    %c55_331 = arith.constant 55 : index
    %615 = memref.load %arg3[%c55_331] : memref<56xi32, #tpu.memory_space<smem>>
    memref.store %614, %arg3[%c55_331] : memref<56xi32, #tpu.memory_space<smem>>
    return
  }
}

</mosaic_0001>

<bundles_post_ra>
// kernel: tpu_custom_call.1
= control target key start
LH: loop header
LB: loop body
LE: loop exit
PB: predicated region body
PF: predicated region fallthrough
CT: control target
= control target key end

     0   :  { %s976_s0 = inlined_call_operand.hbm [shape: s32[56], index: 0, kind: input, shape index: {}]   ;;  %s977_s1 = inlined_call_operand.vmem [shape: s32[56], index: 1, kind: input, shape index: {}]   ;;  %s978_s2 = inlined_call_operand.vmem [shape: s32[2], index: 2, kind: input, shape index: {}]   ;;  %s979_s3 = inlined_call_operand.hbm [shape: s32[56], index: 3, kind: output, shape index: {}]  }
   0x1   :  { %981 = sst [smem:[#allocation14_spill]] %s979_s3 }
   0x2   :  { %8 = vsyncpa [#allocation3], 0 }
   0x3   :  { %9 = vsyncpa [#allocation5], 0 }
   0x4   :  { %10 = vsyncpa [#allocation8], 0 }
   0x5   :  { %11 = vsyncpa [#allocation4], 0  ;;  %s26_s14 = sshll.u32 %s977_s1, 4  ;;  %s852_s17 = scalar_lea.hbm %s976_s0, 16  ;;  %s27_s14 = int_to_ptr.vmem [resolvable:$true] %s26_s14 }
   0x6   :  { %p853_p0 = scmp.ne.s32.totalorder %s976_s0, %s852_s17  ;;  %p856_p1 = scmp.lt.u32.totalorder %s852_s17, %s976_s0 }
   0x8   :  { %p858_p2 = pnand %p856_p1, %p853_p0 }
   0xa   :  { %861 = shalt.err (!%p858_p2)
}
   0xb   :  { %s904_s22 = smov [#allocation2]   ;;  %s862_s1 = scalar_lea.vmem %s27_s14, 16 }
   0xc   :  { %19 = dma.hbm_to_smem %s976_s0, 16, %s904_s22, [#allocation3]  }
   0xd   :  { %p863_p3 = scmp.ne.s32.totalorder %s27_s14, %s862_s1  ;;  %p867_p4 = scmp.lt.s32.totalorder %s27_s14, %s27_s14 }
   0xe   :  { %p868_p5 = scmp.lt.s32.totalorder %s862_s1, %s862_s1 }
  0x10   :  { %p869_p6 = por %p868_p5, %p867_p4 }
  0x12   :  { %p870_p7 = pnand %p869_p6, %p863_p3 }
  0x14   :  { %873 = shalt.err (!%p870_p7)
}
  0x15   :  { %s905_s25 = smov [#allocation6]   ;;  %s36_s28 = sshll.u32 %s978_s2, 4  ;;  %s37_s28 = int_to_ptr.vmem [resolvable:$true] %s36_s28 }
  0x16   :  { %29 = dma.vmem_to_smem %s27_s14, 16, %s905_s25, [#allocation5]  }
  0x17   :  { %s874_s29 = scalar_lea.vmem %s37_s28, 16  ;;  %p879_p9 = scmp.lt.s32.totalorder %s37_s28, %s37_s28 }
  0x18   :  { %p875_p8 = scmp.ne.s32.totalorder %s37_s28, %s874_s29  ;;  %p880_p10 = scmp.lt.s32.totalorder %s874_s29, %s874_s29 }
  0x1a   :  { %p881_p11 = por %p880_p10, %p879_p9 }
  0x1c   :  { %p882_p12 = pnand %p881_p11, %p875_p8 }
  0x1e   :  { %885 = shalt.err (!%p882_p12)
}
  0x1f   :  { %s906_s0 = smov [#allocation7]  }
  0x20   :  { %39 = dma.vmem_to_smem %s37_s28, 16, %s906_s0, [#allocation8]  }
  0x21   :  { %896 = dma.done.wait [#allocation3], 16  }
  0x22   :  { %897 = vsyncadd [#allocation3], 4294967280 }
  0x23   :  { %898 = dma.done.wait [#allocation5], 16  }
  0x24   :  { %899 = vsyncadd [#allocation5], 4294967280 }
  0x25   :  { %900 = dma.done.wait [#allocation8], 16  }
  0x26   :  { %901 = vsyncadd [#allocation8], 4294967280 }
  0x27   :  { %49 = sfence }
  0x28   :  { %s50_s30 = sld [smem:[#allocation2]]  ;;  %s683_s2 = sld [smem:[#allocation2 + $0x1]] }
  0x29   :  { %s52_s4 = sld [smem:[#allocation6]]  ;;  %s685_s5 = sld [smem:[#allocation6 + $0x1]] }
  0x2a   :  { %s686_s6 = sld [smem:[#allocation2 + $0x2]]  ;;  %s689_s8 = sld [smem:[#allocation2 + $0x3]] }
  0x2b   :  { %s688_s7 = sld [smem:[#allocation6 + $0x2]]  ;;  %s691_s9 = sld [smem:[#allocation6 + $0x3]] }
  0x2c   :  { %s946_s10 = sld [smem:[#allocation2 + $0x4]]  ;;  %s950_s12 = sld [smem:[#allocation2 + $0x5]] }
  0x2d   :  { %s948_s11 = sld [smem:[#allocation6 + $0x4]]  ;;  %s952_s13 = sld [smem:[#allocation6 + $0x5]] }
  0x2e   :  { %s682_s14 = sshll.u32 %s50_s30, 3  ;;  %s954_s15 = sld [smem:[#allocation2 + $0x6]] }
  0x2f   :  { %s53_s16 = sadd.s32 %s682_s14, %s52_s4  ;;  %s684_s17 = sshll.u32 %s683_s2, 3 }
  0x30   :  { %s54_s18 = sshra.s32 %s53_s16, 5  ;;  %s56_s19 = sand.u32 31, %s53_s16 }
  0x31   :  { %s55_s20 = sld [smem:[#allocation7 + %s54_s18]]  ;;  %s64_s21 = sadd.s32 %s685_s5, %s684_s17 }
  0x32   :  { %s65_s22 = sshra.s32 %s64_s21, 5  ;;  %s67_s23 = sand.u32 31, %s64_s21 }
  0x33   :  { %s66_s24 = sld [smem:[#allocation7 + %s65_s22]]  ;;  %s687_s1 = sshll.u32 %s686_s6, 3 }
  0x34   :  { %s75_s25 = sadd.s32 %s688_s7, %s687_s1  ;;  %s690_s26 = sshll.u32 %s689_s8, 3 }
  0x35   :  { %s76_s27 = sshra.s32 %s75_s25, 5  ;;  %s78_s28 = sand.u32 31, %s75_s25 }
  0x36   :  { %s77_s29 = sld [smem:[#allocation7 + %s76_s27]]  ;;  %s86_s0 = sadd.s32 %s691_s9, %s690_s26 }
  0x37   :  { %s57_s30 = sshra.s32 %s55_s20, %s56_s19  ;;  %s87_s3 = sshra.s32 %s86_s0, 5 }
  0x38   :  { %s58_s4 = sand.u32 1, %s57_s30  ;;  %s88_s2 = sld [smem:[#allocation7 + %s87_s3]] }
  0x39   :  { %60 = sst [smem:[#allocation9]] %s58_s4  ;;  %s68_s14 = sshra.s32 %s66_s24, %s67_s23 }
  0x3a   :  { %s69_s5 = sand.u32 1, %s68_s14  ;;  %s89_s16 = sand.u32 31, %s86_s0 }
  0x3b   :  { %71 = sst [smem:[#allocation9 + $0x1]] %s69_s5  ;;  %s693_s6 = sshll.u32 %s946_s10, 3 }
  0x3c   :  { %s79_s7 = sshra.s32 %s77_s29, %s78_s28  ;;  %s97_s8 = sadd.s32 %s948_s11, %s693_s6 }
  0x3d   :  { %s80_s17 = sand.u32 1, %s79_s7  ;;  %s98_s18 = sshra.s32 %s97_s8, 5 }
  0x3e   :  { %82 = sst [smem:[#allocation9 + $0x2]] %s80_s17  ;;  %s90_s21 = sshra.s32 %s88_s2, %s89_s16 }
  0x3f   :  { %s91_s9 = sand.u32 1, %s90_s21  ;;  %s99_s19 = sld [smem:[#allocation7 + %s98_s18]] }
  0x40   :  { %93 = sst [smem:[#allocation9 + $0x3]] %s91_s9  ;;  %s100_s20 = sand.u32 31, %s97_s8 }
  0x41   :  { %s696_s3 = sshll.u32 %s950_s12, 3  ;;  %s699_s22 = sshll.u32 %s954_s15, 3 }
  0x42   :  { %s108_s1 = sadd.s32 %s952_s13, %s696_s3  ;;  %s700_s23 = sld [smem:[#allocation6 + $0x6]] }
  0x43   :  { %s109_s24 = sshra.s32 %s108_s1, 5  ;;  %s111_s25 = sand.u32 31, %s108_s1 }
  0x44   :  { %s110_s26 = sld [smem:[#allocation7 + %s109_s24]] }
  0x45   :  { %s701_s27 = sld [smem:[#allocation2 + $0x7]]  ;;  %s101_s0 = sshra.s32 %s99_s19, %s100_s20 }
  0x46   :  { %s703_s10 = sld [smem:[#allocation6 + $0x7]]  ;;  %s102_s28 = sand.u32 1, %s101_s0 }
  0x47   :  { %s704_s11 = sld [smem:[#allocation2 + $0x8]]  ;;  %104 = sst [smem:[#allocation9 + $0x4]] %s102_s28 }
  0x48   :  { %s706_s29 = sld [smem:[#allocation6 + $0x8]]  ;;  %s119_s30 = sadd.s32 %s700_s23, %s699_s22 }
  0x49   :  { %s961_s4 = sld [smem:[#allocation2 + $0x9]]  ;;  %s120_s2 = sshra.s32 %s119_s30, 5 }
  0x4a   :  { %s122_s14 = sand.u32 31, %s119_s30  ;;  %s112_s12 = sshra.s32 %s110_s26, %s111_s25 }
  0x4b   :  { %s121_s15 = sld [smem:[#allocation7 + %s120_s2]]  ;;  %s113_s13 = sand.u32 1, %s112_s12 }
  0x4c   :  { %s702_s5 = sshll.u32 %s701_s27, 3  ;;  %115 = sst [smem:[#allocation9 + $0x5]] %s113_s13 }
  0x4d   :  { %s130_s16 = sadd.s32 %s703_s10, %s702_s5  ;;  %s705_s17 = sshll.u32 %s704_s11, 3 }
  0x4e   :  { %s131_s6 = sshra.s32 %s130_s16, 5  ;;  %s133_s7 = sand.u32 31, %s130_s16 }
  0x4f   :  { %s132_s8 = sld [smem:[#allocation7 + %s131_s6]]  ;;  %s141_s18 = sadd.s32 %s706_s29, %s705_s17 }
  0x50   :  { %s708_s21 = sshll.u32 %s961_s4, 3  ;;  %s142_s19 = sshra.s32 %s141_s18, 5 }
  0x51   :  { %s123_s9 = sshra.s32 %s121_s15, %s122_s14  ;;  %s143_s3 = sld [smem:[#allocation7 + %s142_s19]] }
  0x52   :  { %s124_s20 = sand.u32 1, %s123_s9  ;;  %s144_s22 = sand.u32 31, %s141_s18 }
  0x53   :  { %126 = sst [smem:[#allocation9 + $0x6]] %s124_s20  ;;  %s709_s1 = sld [smem:[#allocation6 + $0x9]] }
  0x54   :  { %s710_s23 = sld [smem:[#allocation2 + $0xa]]  ;;  %s713_s27 = sld [smem:[#allocation2 + $0xb]] }
  0x55   :  { %s134_s24 = sshra.s32 %s132_s8, %s133_s7  ;;  %s712_s25 = sld [smem:[#allocation6 + $0xa]] }
  0x56   :  { %s135_s26 = sand.u32 1, %s134_s24  ;;  %s715_s0 = sld [smem:[#allocation6 + $0xb]] }
  0x57   :  { %137 = sst [smem:[#allocation9 + $0x7]] %s135_s26  ;;  %s145_s10 = sshra.s32 %s143_s3, %s144_s22 }
  0x58   :  { %s716_s28 = sld [smem:[#allocation2 + $0xc]]  ;;  %s146_s30 = sand.u32 1, %s145_s10 }
  0x59   :  { %s718_s11 = sld [smem:[#allocation6 + $0xc]]  ;;  %148 = sst [smem:[#allocation9 + $0x8]] %s146_s30 }
  0x5a   :  { %s152_s29 = sadd.s32 %s709_s1, %s708_s21  ;;  %s711_s12 = sshll.u32 %s710_s23, 3 }
  0x5b   :  { %s153_s4 = sshra.s32 %s152_s29, 5  ;;  %s155_s2 = sand.u32 31, %s152_s29 }
  0x5c   :  { %s154_s14 = sld [smem:[#allocation7 + %s153_s4]]  ;;  %s163_s15 = sadd.s32 %s712_s25, %s711_s12 }
  0x5d   :  { %s714_s13 = sshll.u32 %s713_s27, 3  ;;  %s164_s5 = sshra.s32 %s163_s15, 5 }
  0x5e   :  { %s166_s16 = sand.u32 31, %s163_s15  ;;  %s165_s6 = sld [smem:[#allocation7 + %s164_s5]] }
  0x5f   :  { %s174_s7 = sadd.s32 %s715_s0, %s714_s13  ;;  %s717_s9 = sshll.u32 %s716_s28, 3 }
  0x60   :  { %s175_s8 = sshra.s32 %s174_s7, 5  ;;  %s177_s17 = sand.u32 31, %s174_s7 }
  0x61   :  { %s176_s18 = sld [smem:[#allocation7 + %s175_s8]]  ;;  %s185_s20 = sadd.s32 %s718_s11, %s717_s9 }
  0x62   :  { %s156_s19 = sshra.s32 %s154_s14, %s155_s2  ;;  %s186_s22 = sshra.s32 %s185_s20, 5 }
  0x63   :  { %s157_s3 = sand.u32 1, %s156_s19  ;;  %s187_s21 = sld [smem:[#allocation7 + %s186_s22]] }
  0x64   :  { %159 = sst [smem:[#allocation9 + $0x9]] %s157_s3  ;;  %s167_s1 = sshra.s32 %s165_s6, %s166_s16 }
  0x65   :  { %s188_s24 = sand.u32 31, %s185_s20  ;;  %s168_s26 = sand.u32 1, %s167_s1 }
  0x66   :  { %s719_s23 = sld [smem:[#allocation2 + $0xd]]  ;;  %170 = sst [smem:[#allocation9 + $0xa]] %s168_s26 }
  0x67   :  { %s178_s25 = sshra.s32 %s176_s18, %s177_s17  ;;  %s721_s10 = sld [smem:[#allocation6 + $0xd]] }
  0x68   :  { %s179_s27 = sand.u32 1, %s178_s25  ;;  %s722_s0 = sld [smem:[#allocation2 + $0xe]] }
  0x69   :  { %181 = sst [smem:[#allocation9 + $0xb]] %s179_s27  ;;  %s189_s30 = sshra.s32 %s187_s21, %s188_s24 }
  0x6a   :  { %s724_s29 = sld [smem:[#allocation6 + $0xe]]  ;;  %s190_s4 = sand.u32 1, %s189_s30 }
  0x6b   :  { %s725_s28 = sld [smem:[#allocation2 + $0xf]]  ;;  %192 = sst [smem:[#allocation9 + $0xc]] %s190_s4 }
  0x6c   :  { %s720_s11 = sshll.u32 %s719_s23, 3  ;;  %s727_s2 = sld [smem:[#allocation6 + $0xf]] }
  0x6d   :  { %s728_s14 = sld [smem:[#allocation2 + $0x10]]  ;;  %s196_s12 = sadd.s32 %s721_s10, %s720_s11 }
  0x6e   :  { %s730_s15 = sld [smem:[#allocation6 + $0x10]]  ;;  %s197_s13 = sshra.s32 %s196_s12, 5 }
  0x6f   :  { %s199_s5 = sand.u32 31, %s196_s12  ;;  %s198_s16 = sld [smem:[#allocation7 + %s197_s13]] }
  0x70   :  { %s723_s6 = sshll.u32 %s722_s0, 3  ;;  %s731_s0 = sld [smem:[#allocation2 + $0x11]] }
  0x71   :  { %s207_s7 = sadd.s32 %s724_s29, %s723_s6  ;;  %s726_s8 = sshll.u32 %s725_s28, 3 }
  0x72   :  { %s208_s17 = sshra.s32 %s207_s7, 5  ;;  %s210_s18 = sand.u32 31, %s207_s7 }
  0x73   :  { %s209_s9 = sld [smem:[#allocation7 + %s208_s17]]  ;;  %s218_s19 = sadd.s32 %s727_s2, %s726_s8 }
  0x74   :  { %s219_s20 = sshra.s32 %s218_s19, 5  ;;  %s221_s3 = sand.u32 31, %s218_s19 }
  0x75   :  { %s220_s22 = sld [smem:[#allocation7 + %s219_s20]]  ;;  %s729_s21 = sshll.u32 %s728_s14, 3 }
  0x76   :  { %s200_s1 = sshra.s32 %s198_s16, %s199_s5  ;;  %s229_s24 = sadd.s32 %s730_s15, %s729_s21 }
  0x77   :  { %s201_s26 = sand.u32 1, %s200_s1  ;;  %s230_s23 = sshra.s32 %s229_s24, 5 }
  0x78   :  { %203 = sst [smem:[#allocation9 + $0xd]] %s201_s26  ;;  %s232_s10 = sand.u32 31, %s229_s24 }
  0x79   :  { %s231_s25 = sld [smem:[#allocation7 + %s230_s23]]  ;;  %s211_s27 = sshra.s32 %s209_s9, %s210_s18 }
  0x7a   :  { %s212_s30 = sand.u32 1, %s211_s27  ;;  %s733_s28 = sld [smem:[#allocation6 + $0x11]] }
  0x7b   :  { %214 = sst [smem:[#allocation9 + $0xe]] %s212_s30  ;;  %s222_s29 = sshra.s32 %s220_s22, %s221_s3 }
  0x7c   :  { %s223_s4 = sand.u32 1, %s222_s29  ;;  %s734_s11 = sld [smem:[#allocation2 + $0x12]] }
  0x7d   :  { %225 = sst [smem:[#allocation9 + $0xf]] %s223_s4  ;;  %s736_s12 = sld [smem:[#allocation6 + $0x12]] }
  0x7e   :  { %s737_s14 = sld [smem:[#allocation2 + $0x13]]  ;;  %s732_s15 = sshll.u32 %s731_s0, 3 }
  0x7f   :  { %s233_s2 = sshra.s32 %s231_s25, %s232_s10  ;;  %s739_s5 = sld [smem:[#allocation6 + $0x13]] }
  0x80   :  { %s234_s13 = sand.u32 1, %s233_s2  ;;  %s740_s16 = sld [smem:[#allocation2 + $0x14]] }
  0x81   :  { %236 = sst [smem:[#allocation9 + $0x10]] %s234_s13  ;;  %s240_s6 = sadd.s32 %s733_s28, %s732_s15 }
  0x82   :  { %s742_s7 = sld [smem:[#allocation6 + $0x14]]  ;;  %s241_s8 = sshra.s32 %s240_s6, 5 }
  0x83   :  { %s243_s17 = sand.u32 31, %s240_s6  ;;  %s242_s18 = sld [smem:[#allocation7 + %s241_s8]] }
  0x84   :  { %s735_s9 = sshll.u32 %s734_s11, 3  ;;  %s738_s20 = sshll.u32 %s737_s14, 3 }
  0x85   :  { %s251_s19 = sadd.s32 %s736_s12, %s735_s9  ;;  %s262_s1 = sadd.s32 %s739_s5, %s738_s20 }
  0x86   :  { %s252_s3 = sshra.s32 %s251_s19, 5  ;;  %s254_s22 = sand.u32 31, %s251_s19 }
  0x87   :  { %s253_s21 = sld [smem:[#allocation7 + %s252_s3]]  ;;  %s263_s24 = sshra.s32 %s262_s1, 5 }
  0x88   :  { %s265_s26 = sand.u32 31, %s262_s1  ;;  %s264_s23 = sld [smem:[#allocation7 + %s263_s24]] }
  0x89   :  { %s741_s25 = sshll.u32 %s740_s16, 3  ;;  %s244_s27 = sshra.s32 %s242_s18, %s243_s17 }
  0x8a   :  { %s273_s10 = sadd.s32 %s742_s7, %s741_s25  ;;  %s245_s30 = sand.u32 1, %s244_s27 }
  0x8b   :  { %s274_s0 = sshra.s32 %s273_s10, 5  ;;  %247 = sst [smem:[#allocation9 + $0x11]] %s245_s30 }
  0x8c   :  { %s275_s29 = sld [smem:[#allocation7 + %s274_s0]]  ;;  %s276_s28 = sand.u32 31, %s273_s10 }
  0x8d   :  { %s255_s4 = sshra.s32 %s253_s21, %s254_s22  ;;  %s743_s11 = sld [smem:[#allocation2 + $0x15]] }
  0x8e   :  { %s256_s2 = sand.u32 1, %s255_s4  ;;  %s266_s12 = sshra.s32 %s264_s23, %s265_s26 }
  0x8f   :  { %258 = sst [smem:[#allocation9 + $0x12]] %s256_s2  ;;  %s267_s13 = sand.u32 1, %s266_s12 }
  0x90   :  { %s745_s14 = sld [smem:[#allocation6 + $0x15]]  ;;  %269 = sst [smem:[#allocation9 + $0x13]] %s267_s13 }
  0x91   :  { %s746_s15 = sld [smem:[#allocation2 + $0x16]]  ;;  %s749_s16 = sld [smem:[#allocation2 + $0x17]] }
  0x92   :  { %s277_s5 = sshra.s32 %s275_s29, %s276_s28  ;;  %s748_s6 = sld [smem:[#allocation6 + $0x16]] }
  0x93   :  { %s278_s8 = sand.u32 1, %s277_s5  ;;  %s744_s7 = sshll.u32 %s743_s11, 3 }
  0x94   :  { %280 = sst [smem:[#allocation9 + $0x14]] %s278_s8  ;;  %s751_s17 = sld [smem:[#allocation6 + $0x17]] }
  0x95   :  { %s752_s18 = sld [smem:[#allocation2 + $0x18]] }
  0x96   :  { %s284_s9 = sadd.s32 %s745_s14, %s744_s7  ;;  %s754_s19 = sld [smem:[#allocation6 + $0x18]] }
  0x97   :  { %s285_s20 = sshra.s32 %s284_s9, 5  ;;  %s287_s3 = sand.u32 31, %s284_s9 }
  0x98   :  { %s286_s22 = sld [smem:[#allocation7 + %s285_s20]]  ;;  %s747_s21 = sshll.u32 %s746_s15, 3 }
  0x99   :  { %s295_s1 = sadd.s32 %s748_s6, %s747_s21  ;;  %s750_s24 = sshll.u32 %s749_s16, 3 }
  0x9a   :  { %s296_s26 = sshra.s32 %s295_s1, 5  ;;  %s298_s23 = sand.u32 31, %s295_s1 }
  0x9b   :  { %s297_s25 = sld [smem:[#allocation7 + %s296_s26]]  ;;  %s306_s27 = sadd.s32 %s751_s17, %s750_s24 }
  0x9c   :  { %s307_s10 = sshra.s32 %s306_s27, 5  ;;  %s309_s30 = sand.u32 31, %s306_s27 }
  0x9d   :  { %s308_s0 = sld [smem:[#allocation7 + %s307_s10]]  ;;  %s753_s29 = sshll.u32 %s752_s18, 3 }
  0x9e   :  { %s288_s4 = sshra.s32 %s286_s22, %s287_s3  ;;  %s317_s28 = sadd.s32 %s754_s19, %s753_s29 }
  0x9f   :  { %s289_s2 = sand.u32 1, %s288_s4  ;;  %s318_s11 = sshra.s32 %s317_s28, 5 }
  0xa0   :  { %291 = sst [smem:[#allocation9 + $0x15]] %s289_s2  ;;  %s320_s14 = sand.u32 31, %s317_s28 }
  0xa1   :  { %s319_s12 = sld [smem:[#allocation7 + %s318_s11]]  ;;  %s299_s13 = sshra.s32 %s297_s25, %s298_s23 }
  0xa2   :  { %s300_s5 = sand.u32 1, %s299_s13  ;;  %s755_s15 = sld [smem:[#allocation2 + $0x19]] }
  0xa3   :  { %302 = sst [smem:[#allocation9 + $0x16]] %s300_s5  ;;  %s310_s6 = sshra.s32 %s308_s0, %s309_s30 }
  0xa4   :  { %s311_s8 = sand.u32 1, %s310_s6  ;;  %s757_s16 = sld [smem:[#allocation6 + $0x19]] }
  0xa5   :  { %313 = sst [smem:[#allocation9 + $0x17]] %s311_s8  ;;  %s758_s7 = sld [smem:[#allocation2 + $0x1a]] }
  0xa6   :  { %s760_s9 = sld [smem:[#allocation6 + $0x1a]]  ;;  %s761_s18 = sld [smem:[#allocation2 + $0x1b]] }
  0xa7   :  { %s321_s17 = sshra.s32 %s319_s12, %s320_s14  ;;  %s763_s3 = sld [smem:[#allocation6 + $0x1b]] }
  0xa8   :  { %s322_s20 = sand.u32 1, %s321_s17  ;;  %s756_s19 = sshll.u32 %s755_s15, 3 }
  0xa9   :  { %324 = sst [smem:[#allocation9 + $0x18]] %s322_s20  ;;  %s764_s22 = sld [smem:[#allocation2 + $0x1c]] }
  0xaa   :  { %s328_s21 = sadd.s32 %s757_s16, %s756_s19  ;;  %s766_s1 = sld [smem:[#allocation6 + $0x1c]] }
  0xab   :  { %s329_s24 = sshra.s32 %s328_s21, 5  ;;  %s331_s26 = sand.u32 31, %s328_s21 }
  0xac   :  { %s330_s23 = sld [smem:[#allocation7 + %s329_s24]]  ;;  %s759_s25 = sshll.u32 %s758_s7, 3 }
  0xad   :  { %s339_s27 = sadd.s32 %s760_s9, %s759_s25  ;;  %s762_s10 = sshll.u32 %s761_s18, 3 }
  0xae   :  { %s340_s30 = sshra.s32 %s339_s27, 5  ;;  %s342_s0 = sand.u32 31, %s339_s27 }
  0xaf   :  { %s341_s29 = sld [smem:[#allocation7 + %s340_s30]]  ;;  %s350_s4 = sadd.s32 %s763_s3, %s762_s10 }
  0xb0   :  { %s351_s28 = sshra.s32 %s350_s4, 5  ;;  %s353_s2 = sand.u32 31, %s350_s4 }
  0xb1   :  { %s352_s11 = sld [smem:[#allocation7 + %s351_s28]]  ;;  %s765_s12 = sshll.u32 %s764_s22, 3 }
  0xb2   :  { %s332_s13 = sshra.s32 %s330_s23, %s331_s26  ;;  %s361_s14 = sadd.s32 %s766_s1, %s765_s12 }
  0xb3   :  { %s333_s5 = sand.u32 1, %s332_s13  ;;  %s362_s15 = sshra.s32 %s361_s14, 5 }
  0xb4   :  { %335 = sst [smem:[#allocation9 + $0x19]] %s333_s5  ;;  %s364_s16 = sand.u32 31, %s361_s14 }
  0xb5   :  { %s363_s6 = sld [smem:[#allocation7 + %s362_s15]]  ;;  %s343_s8 = sshra.s32 %s341_s29, %s342_s0 }
  0xb6   :  { %s344_s17 = sand.u32 1, %s343_s8  ;;  %s767_s7 = sld [smem:[#allocation2 + $0x1d]] }
  0xb7   :  { %346 = sst [smem:[#allocation9 + $0x1a]] %s344_s17  ;;  %s354_s9 = sshra.s32 %s352_s11, %s353_s2 }
  0xb8   :  { %s355_s20 = sand.u32 1, %s354_s9  ;;  %s769_s18 = sld [smem:[#allocation6 + $0x1d]] }
  0xb9   :  { %357 = sst [smem:[#allocation9 + $0x1b]] %s355_s20  ;;  %s770_s19 = sld [smem:[#allocation2 + $0x1e]] }
  0xba   :  { %s772_s21 = sld [smem:[#allocation6 + $0x1e]]  ;;  %s773_s22 = sld [smem:[#allocation2 + $0x1f]] }
  0xbb   :  { %s365_s3 = sshra.s32 %s363_s6, %s364_s16  ;;  %s775_s26 = sld [smem:[#allocation6 + $0x1f]] }
  0xbc   :  { %s366_s24 = sand.u32 1, %s365_s3  ;;  %s768_s1 = sshll.u32 %s767_s7, 3 }
  0xbd   :  { %368 = sst [smem:[#allocation9 + $0x1c]] %s366_s24  ;;  %s776_s23 = sld [smem:[#allocation2 + $0x20]] }
  0xbe   :  { %s372_s25 = sadd.s32 %s769_s18, %s768_s1  ;;  %s778_s27 = sld [smem:[#allocation6 + $0x20]] }
  0xbf   :  { %s373_s10 = sshra.s32 %s372_s25, 5  ;;  %s375_s30 = sand.u32 31, %s372_s25 }
  0xc0   :  { %s374_s0 = sld [smem:[#allocation7 + %s373_s10]]  ;;  %s771_s29 = sshll.u32 %s770_s19, 3 }
  0xc1   :  { %s383_s4 = sadd.s32 %s772_s21, %s771_s29  ;;  %s774_s28 = sshll.u32 %s773_s22, 3 }
  0xc2   :  { %s384_s2 = sshra.s32 %s383_s4, 5  ;;  %s386_s11 = sand.u32 31, %s383_s4 }
  0xc3   :  { %s385_s12 = sld [smem:[#allocation7 + %s384_s2]]  ;;  %s394_s13 = sadd.s32 %s775_s26, %s774_s28 }
  0xc4   :  { %s395_s14 = sshra.s32 %s394_s13, 5  ;;  %s397_s5 = sand.u32 31, %s394_s13 }
  0xc5   :  { %s396_s15 = sld [smem:[#allocation7 + %s395_s14]]  ;;  %s777_s6 = sshll.u32 %s776_s23, 3 }
  0xc6   :  { %s376_s8 = sshra.s32 %s374_s0, %s375_s30  ;;  %s405_s16 = sadd.s32 %s778_s27, %s777_s6 }
  0xc7   :  { %s377_s17 = sand.u32 1, %s376_s8  ;;  %s406_s7 = sshra.s32 %s405_s16, 5 }
  0xc8   :  { %379 = sst [smem:[#allocation9 + $0x1d]] %s377_s17  ;;  %s408_s18 = sand.u32 31, %s405_s16 }
  0xc9   :  { %s407_s9 = sld [smem:[#allocation7 + %s406_s7]]  ;;  %s387_s20 = sshra.s32 %s385_s12, %s386_s11 }
  0xca   :  { %s388_s3 = sand.u32 1, %s387_s20  ;;  %s779_s19 = sld [smem:[#allocation2 + $0x21]] }
  0xcb   :  { %390 = sst [smem:[#allocation9 + $0x1e]] %s388_s3  ;;  %s398_s21 = sshra.s32 %s396_s15, %s397_s5 }
  0xcc   :  { %s399_s24 = sand.u32 1, %s398_s21  ;;  %s781_s22 = sld [smem:[#allocation6 + $0x21]] }
  0xcd   :  { %401 = sst [smem:[#allocation9 + $0x1f]] %s399_s24  ;;  %s782_s1 = sld [smem:[#allocation2 + $0x22]] }
  0xce   :  { %s784_s25 = sld [smem:[#allocation6 + $0x22]]  ;;  %s785_s23 = sld [smem:[#allocation2 + $0x23]] }
  0xcf   :  { %s409_s26 = sshra.s32 %s407_s9, %s408_s18  ;;  %s787_s30 = sld [smem:[#allocation6 + $0x23]] }
  0xd0   :  { %s410_s10 = sand.u32 1, %s409_s26  ;;  %s780_s27 = sshll.u32 %s779_s19, 3 }
  0xd1   :  { %412 = sst [smem:[#allocation9 + $0x20]] %s410_s10  ;;  %s788_s0 = sld [smem:[#allocation2 + $0x24]] }
  0xd2   :  { %s416_s29 = sadd.s32 %s781_s22, %s780_s27  ;;  %s790_s4 = sld [smem:[#allocation6 + $0x24]] }
  0xd3   :  { %s417_s28 = sshra.s32 %s416_s29, 5  ;;  %s419_s2 = sand.u32 31, %s416_s29 }
  0xd4   :  { %s418_s11 = sld [smem:[#allocation7 + %s417_s28]]  ;;  %s783_s12 = sshll.u32 %s782_s1, 3 }
  0xd5   :  { %s427_s13 = sadd.s32 %s784_s25, %s783_s12  ;;  %s786_s14 = sshll.u32 %s785_s23, 3 }
  0xd6   :  { %s428_s5 = sshra.s32 %s427_s13, 5  ;;  %s430_s15 = sand.u32 31, %s427_s13 }
  0xd7   :  { %s429_s6 = sld [smem:[#allocation7 + %s428_s5]]  ;;  %s438_s8 = sadd.s32 %s787_s30, %s786_s14 }
  0xd8   :  { %s439_s16 = sshra.s32 %s438_s8, 5  ;;  %s441_s17 = sand.u32 31, %s438_s8 }
  0xd9   :  { %s440_s7 = sld [smem:[#allocation7 + %s439_s16]]  ;;  %s789_s9 = sshll.u32 %s788_s0, 3 }
  0xda   :  { %s420_s20 = sshra.s32 %s418_s11, %s419_s2  ;;  %s449_s18 = sadd.s32 %s790_s4, %s789_s9 }
  0xdb   :  { %s421_s3 = sand.u32 1, %s420_s20  ;;  %s450_s19 = sshra.s32 %s449_s18, 5 }
  0xdc   :  { %423 = sst [smem:[#allocation9 + $0x21]] %s421_s3  ;;  %s452_s22 = sand.u32 31, %s449_s18 }
  0xdd   :  { %s451_s21 = sld [smem:[#allocation7 + %s450_s19]]  ;;  %s431_s24 = sshra.s32 %s429_s6, %s430_s15 }
  0xde   :  { %s432_s26 = sand.u32 1, %s431_s24  ;;  %s791_s1 = sld [smem:[#allocation2 + $0x25]] }
  0xdf   :  { %434 = sst [smem:[#allocation9 + $0x22]] %s432_s26  ;;  %s442_s25 = sshra.s32 %s440_s7, %s441_s17 }
  0xe0   :  { %s443_s10 = sand.u32 1, %s442_s25  ;;  %s793_s23 = sld [smem:[#allocation6 + $0x25]] }
  0xe1   :  { %445 = sst [smem:[#allocation9 + $0x23]] %s443_s10  ;;  %s794_s27 = sld [smem:[#allocation2 + $0x26]] }
  0xe2   :  { %s796_s29 = sld [smem:[#allocation6 + $0x26]]  ;;  %s797_s0 = sld [smem:[#allocation2 + $0x27]] }
  0xe3   :  { %s453_s30 = sshra.s32 %s451_s21, %s452_s22  ;;  %s799_s2 = sld [smem:[#allocation6 + $0x27]] }
  0xe4   :  { %s454_s28 = sand.u32 1, %s453_s30  ;;  %s792_s4 = sshll.u32 %s791_s1, 3 }
  0xe5   :  { %456 = sst [smem:[#allocation9 + $0x24]] %s454_s28  ;;  %s800_s11 = sld [smem:[#allocation2 + $0x28]] }
  0xe6   :  { %s460_s12 = sadd.s32 %s793_s23, %s792_s4  ;;  %s802_s13 = sld [smem:[#allocation6 + $0x28]] }
  0xe7   :  { %s461_s14 = sshra.s32 %s460_s12, 5  ;;  %s463_s5 = sand.u32 31, %s460_s12 }
  0xe8   :  { %s462_s15 = sld [smem:[#allocation7 + %s461_s14]]  ;;  %s795_s6 = sshll.u32 %s794_s27, 3 }
  0xe9   :  { %s471_s8 = sadd.s32 %s796_s29, %s795_s6  ;;  %s798_s16 = sshll.u32 %s797_s0, 3 }
  0xea   :  { %s472_s17 = sshra.s32 %s471_s8, 5  ;;  %s474_s7 = sand.u32 31, %s471_s8 }
  0xeb   :  { %s473_s9 = sld [smem:[#allocation7 + %s472_s17]]  ;;  %s482_s20 = sadd.s32 %s799_s2, %s798_s16 }
  0xec   :  { %s483_s18 = sshra.s32 %s482_s20, 5  ;;  %s485_s3 = sand.u32 31, %s482_s20 }
  0xed   :  { %s484_s19 = sld [smem:[#allocation7 + %s483_s18]]  ;;  %s801_s21 = sshll.u32 %s800_s11, 3 }
  0xee   :  { %s464_s24 = sshra.s32 %s462_s15, %s463_s5  ;;  %s493_s22 = sadd.s32 %s802_s13, %s801_s21 }
  0xef   :  { %s465_s26 = sand.u32 1, %s464_s24  ;;  %s494_s1 = sshra.s32 %s493_s22, 5 }
  0xf0   :  { %467 = sst [smem:[#allocation9 + $0x25]] %s465_s26  ;;  %s496_s23 = sand.u32 31, %s493_s22 }
  0xf1   :  { %s495_s25 = sld [smem:[#allocation7 + %s494_s1]]  ;;  %s475_s10 = sshra.s32 %s473_s9, %s474_s7 }
  0xf2   :  { %s476_s30 = sand.u32 1, %s475_s10  ;;  %s803_s27 = sld [smem:[#allocation2 + $0x29]] }
  0xf3   :  { %478 = sst [smem:[#allocation9 + $0x26]] %s476_s30  ;;  %s486_s29 = sshra.s32 %s484_s19, %s485_s3 }
  0xf4   :  { %s487_s28 = sand.u32 1, %s486_s29  ;;  %s805_s0 = sld [smem:[#allocation6 + $0x29]] }
  0xf5   :  { %489 = sst [smem:[#allocation9 + $0x27]] %s487_s28  ;;  %s806_s4 = sld [smem:[#allocation2 + $0x2a]] }
  0xf6   :  { %s808_s12 = sld [smem:[#allocation6 + $0x2a]]  ;;  %s809_s11 = sld [smem:[#allocation2 + $0x2b]] }
  0xf7   :  { %s497_s2 = sshra.s32 %s495_s25, %s496_s23  ;;  %s811_s5 = sld [smem:[#allocation6 + $0x2b]] }
  0xf8   :  { %s498_s14 = sand.u32 1, %s497_s2  ;;  %s804_s13 = sshll.u32 %s803_s27, 3 }
  0xf9   :  { %500 = sst [smem:[#allocation9 + $0x28]] %s498_s14  ;;  %s812_s15 = sld [smem:[#allocation2 + $0x2c]] }
  0xfa   :  { %s504_s6 = sadd.s32 %s805_s0, %s804_s13  ;;  %s814_s8 = sld [smem:[#allocation6 + $0x2c]] }
  0xfb   :  { %s505_s16 = sshra.s32 %s504_s6, 5  ;;  %s507_s17 = sand.u32 31, %s504_s6 }
  0xfc   :  { %s506_s7 = sld [smem:[#allocation7 + %s505_s16]]  ;;  %s807_s9 = sshll.u32 %s806_s4, 3 }
  0xfd   :  { %s515_s20 = sadd.s32 %s808_s12, %s807_s9  ;;  %s810_s18 = sshll.u32 %s809_s11, 3 }
  0xfe   :  { %s516_s3 = sshra.s32 %s515_s20, 5  ;;  %s518_s19 = sand.u32 31, %s515_s20 }
  0xff   :  { %s517_s21 = sld [smem:[#allocation7 + %s516_s3]]  ;;  %s526_s24 = sadd.s32 %s811_s5, %s810_s18 }
 0x100   :  { %s527_s22 = sshra.s32 %s526_s24, 5  ;;  %s529_s26 = sand.u32 31, %s526_s24 }
 0x101   :  { %s528_s1 = sld [smem:[#allocation7 + %s527_s22]]  ;;  %s813_s25 = sshll.u32 %s812_s15, 3 }
 0x102   :  { %s508_s10 = sshra.s32 %s506_s7, %s507_s17  ;;  %s537_s23 = sadd.s32 %s814_s8, %s813_s25 }
 0x103   :  { %s509_s30 = sand.u32 1, %s508_s10  ;;  %s538_s27 = sshra.s32 %s537_s23, 5 }
 0x104   :  { %511 = sst [smem:[#allocation9 + $0x29]] %s509_s30  ;;  %s540_s0 = sand.u32 31, %s537_s23 }
 0x105   :  { %s539_s29 = sld [smem:[#allocation7 + %s538_s27]]  ;;  %s519_s28 = sshra.s32 %s517_s21, %s518_s19 }
 0x106   :  { %s520_s2 = sand.u32 1, %s519_s28  ;;  %s815_s4 = sld [smem:[#allocation2 + $0x2d]] }
 0x107   :  { %522 = sst [smem:[#allocation9 + $0x2a]] %s520_s2  ;;  %s530_s12 = sshra.s32 %s528_s1, %s529_s26 }
 0x108   :  { %s531_s14 = sand.u32 1, %s530_s12  ;;  %s817_s11 = sld [smem:[#allocation6 + $0x2d]] }
 0x109   :  { %533 = sst [smem:[#allocation9 + $0x2b]] %s531_s14  ;;  %s818_s13 = sld [smem:[#allocation2 + $0x2e]] }
 0x10a   :  { %s820_s6 = sld [smem:[#allocation6 + $0x2e]]  ;;  %s821_s15 = sld [smem:[#allocation2 + $0x2f]] }
 0x10b   :  { %s541_s5 = sshra.s32 %s539_s29, %s540_s0  ;;  %s823_s17 = sld [smem:[#allocation6 + $0x2f]] }
 0x10c   :  { %s542_s16 = sand.u32 1, %s541_s5  ;;  %s816_s8 = sshll.u32 %s815_s4, 3 }
 0x10d   :  { %544 = sst [smem:[#allocation9 + $0x2c]] %s542_s16  ;;  %s824_s7 = sld [smem:[#allocation2 + $0x30]] }
 0x10e   :  { %s548_s9 = sadd.s32 %s817_s11, %s816_s8  ;;  %s826_s20 = sld [smem:[#allocation6 + $0x30]] }
 0x10f   :  { %s549_s18 = sshra.s32 %s548_s9, 5  ;;  %s551_s3 = sand.u32 31, %s548_s9 }
 0x110   :  { %s550_s19 = sld [smem:[#allocation7 + %s549_s18]]  ;;  %s819_s21 = sshll.u32 %s818_s13, 3 }
 0x111   :  { %s559_s24 = sadd.s32 %s820_s6, %s819_s21  ;;  %s822_s22 = sshll.u32 %s821_s15, 3 }
 0x112   :  { %s560_s26 = sshra.s32 %s559_s24, 5  ;;  %s562_s1 = sand.u32 31, %s559_s24 }
 0x113   :  { %s561_s25 = sld [smem:[#allocation7 + %s560_s26]]  ;;  %s570_s10 = sadd.s32 %s823_s17, %s822_s22 }
 0x114   :  { %s571_s23 = sshra.s32 %s570_s10, 5  ;;  %s573_s30 = sand.u32 31, %s570_s10 }
 0x115   :  { %s572_s27 = sld [smem:[#allocation7 + %s571_s23]]  ;;  %s825_s29 = sshll.u32 %s824_s7, 3 }
 0x116   :  { %s552_s28 = sshra.s32 %s550_s19, %s551_s3  ;;  %s581_s0 = sadd.s32 %s826_s20, %s825_s29 }
 0x117   :  { %s553_s2 = sand.u32 1, %s552_s28  ;;  %s582_s4 = sshra.s32 %s581_s0, 5 }
 0x118   :  { %555 = sst [smem:[#allocation9 + $0x2d]] %s553_s2  ;;  %s584_s11 = sand.u32 31, %s581_s0 }
 0x119   :  { %s583_s12 = sld [smem:[#allocation7 + %s582_s4]]  ;;  %s563_s14 = sshra.s32 %s561_s25, %s562_s1 }
 0x11a   :  { %s564_s5 = sand.u32 1, %s563_s14  ;;  %s827_s13 = sld [smem:[#allocation2 + $0x31]] }
 0x11b   :  { %566 = sst [smem:[#allocation9 + $0x2e]] %s564_s5  ;;  %s574_s6 = sshra.s32 %s572_s27, %s573_s30 }
 0x11c   :  { %s575_s16 = sand.u32 1, %s574_s6  ;;  %s829_s15 = sld [smem:[#allocation6 + $0x31]] }
 0x11d   :  { %577 = sst [smem:[#allocation9 + $0x2f]] %s575_s16  ;;  %s830_s8 = sld [smem:[#allocation2 + $0x32]] }
 0x11e   :  { %s832_s9 = sld [smem:[#allocation6 + $0x32]]  ;;  %s833_s7 = sld [smem:[#allocation2 + $0x33]] }
 0x11f   :  { %s585_s17 = sshra.s32 %s583_s12, %s584_s11  ;;  %s835_s3 = sld [smem:[#allocation6 + $0x33]] }
 0x120   :  { %s586_s18 = sand.u32 1, %s585_s17  ;;  %s828_s20 = sshll.u32 %s827_s13, 3 }
 0x121   :  { %588 = sst [smem:[#allocation9 + $0x30]] %s586_s18  ;;  %s836_s19 = sld [smem:[#allocation2 + $0x34]] }
 0x122   :  { %s592_s21 = sadd.s32 %s829_s15, %s828_s20  ;;  %s838_s24 = sld [smem:[#allocation6 + $0x34]] }
 0x123   :  { %s593_s22 = sshra.s32 %s592_s21, 5  ;;  %s595_s26 = sand.u32 31, %s592_s21 }
 0x124   :  { %s594_s1 = sld [smem:[#allocation7 + %s593_s22]]  ;;  %s831_s25 = sshll.u32 %s830_s8, 3 }
 0x125   :  { %s603_s10 = sadd.s32 %s832_s9, %s831_s25  ;;  %s834_s23 = sshll.u32 %s833_s7, 3 }
 0x126   :  { %s604_s30 = sshra.s32 %s603_s10, 5  ;;  %s606_s27 = sand.u32 31, %s603_s10 }
 0x127   :  { %s605_s29 = sld [smem:[#allocation7 + %s604_s30]]  ;;  %s614_s28 = sadd.s32 %s835_s3, %s834_s23 }
 0x128   :  { %s615_s0 = sshra.s32 %s614_s28, 5  ;;  %s617_s2 = sand.u32 31, %s614_s28 }
 0x129   :  { %s616_s4 = sld [smem:[#allocation7 + %s615_s0]]  ;;  %s837_s12 = sshll.u32 %s836_s19, 3 }
 0x12a   :  { %s596_s14 = sshra.s32 %s594_s1, %s595_s26  ;;  %s625_s11 = sadd.s32 %s838_s24, %s837_s12 }
 0x12b   :  { %s597_s5 = sand.u32 1, %s596_s14  ;;  %s626_s13 = sshra.s32 %s625_s11, 5 }
 0x12c   :  { %599 = sst [smem:[#allocation9 + $0x31]] %s597_s5  ;;  %s628_s15 = sand.u32 31, %s625_s11 }
 0x12d   :  { %s627_s6 = sld [smem:[#allocation7 + %s626_s13]]  ;;  %s607_s16 = sshra.s32 %s605_s29, %s606_s27 }
 0x12e   :  { %s608_s17 = sand.u32 1, %s607_s16  ;;  %s839_s8 = sld [smem:[#allocation2 + $0x35]] }
 0x12f   :  { %610 = sst [smem:[#allocation9 + $0x32]] %s608_s17  ;;  %s618_s9 = sshra.s32 %s616_s4, %s617_s2 }
 0x130   :  { %s619_s18 = sand.u32 1, %s618_s9  ;;  %s841_s7 = sld [smem:[#allocation6 + $0x35]] }
 0x131   :  { %621 = sst [smem:[#allocation9 + $0x33]] %s619_s18  ;;  %s842_s20 = sld [smem:[#allocation2 + $0x36]] }
 0x132   :  { %s844_s21 = sld [smem:[#allocation6 + $0x36]]  ;;  %s845_s19 = sld [smem:[#allocation2 + $0x37]] }
 0x133   :  { %s629_s3 = sshra.s32 %s627_s6, %s628_s15  ;;  %s847_s26 = sld [smem:[#allocation6 + $0x37]] }
 0x134   :  { %s630_s22 = sand.u32 1, %s629_s3  ;;  %s840_s24 = sshll.u32 %s839_s8, 3 }
 0x135   :  { %632 = sst [smem:[#allocation9 + $0x34]] %s630_s22  ;;  %s982_s18 = sld [smem:[#allocation14_spill]] }
 0x136   :  { %s636_s1 = sadd.s32 %s841_s7, %s840_s24 }
 0x137   :  { %s637_s25 = sshra.s32 %s636_s1, 5  ;;  %s843_s23 = sshll.u32 %s842_s20, 3 }
 0x138   :  { %s638_s10 = sld [smem:[#allocation7 + %s637_s25]]  ;;  %s647_s30 = sadd.s32 %s844_s21, %s843_s23 }
 0x139   :  { %s846_s27 = sshll.u32 %s845_s19, 3  ;;  %s639_s29 = sand.u32 31, %s636_s1 }
 0x13a   :  { %s648_s28 = sshra.s32 %s647_s30, 5  ;;  %s658_s2 = sadd.s32 %s847_s26, %s846_s27 }
 0x13b   :  { %s649_s0 = sld [smem:[#allocation7 + %s648_s28]]  ;;  %s659_s4 = sshra.s32 %s658_s2, 5 }
 0x13c   :  { %s660_s12 = sld [smem:[#allocation7 + %s659_s4]]  ;;  %s650_s11 = sand.u32 31, %s647_s30 }
 0x13d   :  { %s661_s13 = sand.u32 31, %s658_s2  ;;  %s886_s7 = scalar_lea.hbm %s982_s18, 16 }
 0x13e   :  { %s640_s14 = sshra.s32 %s638_s10, %s639_s29  ;;  %p887_p13 = scmp.ne.s32.totalorder %s982_s18, %s886_s7 }
 0x13f   :  { %s641_s5 = sand.u32 1, %s640_s14  ;;  %p890_p0 = scmp.lt.u32.totalorder %s886_s7, %s982_s18 }
 0x140   :  { %643 = sst [smem:[#allocation9 + $0x35]] %s641_s5 }
 0x141   :  { %s651_s6 = sshra.s32 %s649_s0, %s650_s11  ;;  %p892_p1 = pnand %p890_p0, %p887_p13 }
 0x142   :  { %s652_s16 = sand.u32 1, %s651_s6  ;;  %s662_s15 = sshra.s32 %s660_s12, %s661_s13 }
 0x143   :  { %654 = sst [smem:[#allocation9 + $0x36]] %s652_s16  ;;  %s663_s17 = sand.u32 1, %s662_s15 }
 0x144   :  { %665 = sst [smem:[#allocation9 + $0x37]] %s663_s17 }
 0x145   :  { %895 = shalt.err (!%p892_p1)
}
 0x146   :  { %s907_s19 = smov [#allocation9]  }
 0x147   :  { %673 = dma.smem_to_hbm %s907_s19, 16, %s982_s18, [#allocation4]  }
 0x148   :  { %902 = dma.done.wait [#allocation4], 16  }
 0x149   :  { %903 = vsyncadd [#allocation4], 4294967280 }
 0x14a   :  { %677 = sfence }
 0x14b   :  { %678 = vsyncpa [#allocation3], 1 }
 0x14c   :  { %679 = vsyncpa [#allocation4], 1 }
 0x14d   :  { %680 = vsyncpa [#allocation5], 1 }
 0x14e   :  { %681 = vsyncpa [#allocation8], 1 }

</bundles_post_ra>
